<compile_context>
chip_gen: v7x
topology: tpu7x:2x2x1
jax: 0.10.0
libtpu: 0.0.40
codegen_flags: <defaults>
</compile_context>

<pallas_src>
import functools

import jax
import jax.numpy as jnp
import numpy as np
from jax.experimental import pallas as pl
from jax.experimental.pallas import tpu as pltpu

_SUBLANE = 8  # f32 sublane tile


def _round_up(n, m):
    return ((n + m - 1) // m) * m


# ----------------------------- Fused Pallas kernel -------------------------- #

def _make_fused_kernel(num_layers, T, Bp, H):
    """Builds the fused LSTM+FC+softmax kernel, closed over static sizes."""

    def kernel(*refs):
        # refs = [x, (w_ih, w_hh, b) * num_layers, w_fc, b_fc, out, seq_scratch]
        x_ref = refs[0]
        lw = refs[1:1 + 3 * num_layers]
        wfc_ref = refs[1 + 3 * num_layers]
        bfc_ref = refs[2 + 3 * num_layers]
        out_ref = refs[3 + 3 * num_layers]
        seq_sc = refs[4 + 3 * num_layers]          # (T*Bp, H) VMEM scratch

        h = None
        for layer in range(num_layers):
            wih = lw[3 * layer][...]               # (in_dim, 4H)
            whh = lw[3 * layer + 1][...]           # (H, 4H)
            b = lw[3 * layer + 2][...]             # (1, 4H)

            # Layer input: the flattened (T*Bp, in_dim) sequence. Layer 0 reads the
            # kernel input; deeper layers read the previous layer's hidden sequence
            # from VMEM scratch (never goes to HBM).
            src = x_ref[...] if layer == 0 else seq_sc[...]

            # Hoisted input projection for ALL timesteps: one matmul per layer.
            xw = jnp.dot(src, wih, preferred_element_type=jnp.float32) + b  # (T*Bp, 4H)

            h = jnp.zeros((Bp, H), jnp.float32)
            c = jnp.zeros((Bp, H), jnp.float32)
            last_layer = layer == num_layers - 1

            # T is small & static -> full unroll (== lax.fori_loop(..., unroll=True)).
            for t in range(T):
                gates = xw[t * Bp:(t + 1) * Bp, :] + jnp.dot(
                    h, whh, preferred_element_type=jnp.float32)             # (Bp, 4H)
                i_g = jax.nn.sigmoid(gates[:, 0 * H:1 * H])
                f_g = jax.nn.sigmoid(gates[:, 1 * H:2 * H])
                g_g = jnp.tanh(gates[:, 2 * H:3 * H])
                o_g = jax.nn.sigmoid(gates[:, 3 * H:4 * H])
                c = f_g * c + i_g * g_g
                h = o_g * jnp.tanh(c)
                if not last_layer:
                    # Aligned (Bp-row) store; only needed as the next layer's input.
                    seq_sc[t * Bp:(t + 1) * Bp, :] = h

        # FC on the last-timestep hidden of the top layer + softmax over features.
        logits = jnp.dot(h, wfc_ref[...], preferred_element_type=jnp.float32) + bfc_ref[...]
        m = jnp.max(logits, axis=-1, keepdims=True)
        e = jnp.exp(logits - m)
        denom = jnp.sum(e, axis=-1, keepdims=True)
        inv = pl.reciprocal(denom, approx=False)   # exact; approx=True would break 1e-5 check
        out_ref[...] = (e * inv).astype(out_ref.dtype)

    return kernel


def _full_spec(arr):
    zeros = (0,) * arr.ndim
    return pl.BlockSpec(arr.shape, lambda: zeros)


# ---------------------------------- Wrapper --------------------------------- #

@functools.partial(jax.jit, static_argnames=("num_layers",))
def lstm_model_2d_forward(x_bti, params, num_layers):
    """Full forward, mirroring LSTMModel2D.forward (zero initial h0/c0)."""
    B, T, I = x_bti.shape
    H = params["lstm"][0]["w_hh_t"].shape[0]
    O = params["fc"]["w_t"].shape[1]
    Bp = _round_up(B, _SUBLANE)                    # pad batch to sublane tile (free on TPU)

    # batch_first (B,T,I) -> time-major, pad batch, flatten to (T*Bp, I).
    x_tbi = jnp.transpose(x_bti, (1, 0, 2))
    x_pad = jnp.pad(x_tbi, ((0, 0), (0, Bp - B), (0, 0)))
    x_flat = x_pad.reshape(T * Bp, I)

    inputs = [x_flat]
    for layer in range(num_layers):
        p = params["lstm"][layer]
        inputs += [p["w_ih_t"], p["w_hh_t"], p["b"]]
    inputs += [params["fc"]["w_t"], params["fc"]["b"]]

    # NOTE(v7x): at these toy sizes total VMEM footprint is a few tens of KB; if H/T/B
    # ever scale up, re-budget (weights + (T*Bp,H) scratch) against 64 MiB and fall back
    # to a T-chunked pipeline.
    out_pad = pl.pallas_call(
        _make_fused_kernel(num_layers, T, Bp, H),
        out_shape=jax.ShapeDtypeStruct((Bp, O), jnp.float32),
        in_specs=[_full_spec(a) for a in inputs],
        out_specs=pl.BlockSpec((Bp, O), lambda: (0, 0)),
        scratch_shapes=[pltpu.VMEM((T * Bp, H), jnp.float32)],
    )(*inputs)
    return out_pad[:B]


# --------------------------- Parameter creation ------------------------------ #

def init_params(key, input_size, hidden_size, output_size, num_layers):
    """Deterministic synthetic params, PyTorch-style uniform(-1/sqrt(H), 1/sqrt(H))."""
    bound = 1.0 / np.sqrt(hidden_size)
    params = {"lstm": []}
    for layer in range(num_layers):
        in_dim = input_size if layer == 0 else hidden_size
        key, k1, k2, k3, k4 = jax.random.split(key, 5)
        w_ih = jax.random.uniform(k1, (4 * hidden_size, in_dim), jnp.float32, -bound, bound)
        w_hh = jax.random.uniform(k2, (4 * hidden_size, hidden_size), jnp.float32, -bound, bound)
        b_ih = jax.random.uniform(k3, (4 * hidden_size,), jnp.float32, -bound, bound)
        b_hh = jax.random.uniform(k4, (4 * hidden_size,), jnp.float32, -bound, bound)
        params["lstm"].append({
            "w_ih_t": w_ih.T,                      # (in_dim, 4H)
            "w_hh_t": w_hh.T,                      # (H, 4H)
            "b": (b_ih + b_hh)[None, :],           # (1, 4H)
        })
    key, k1, k2 = jax.random.split(key, 3)
    w_fc = jax.random.uniform(k1, (output_size, hidden_size), jnp.float32, -bound, bound)
    b_fc = jax.random.uniform(k2, (output_size,), jnp.float32, -bound, bound)
    params["fc"] = {"w_t": w_fc.T, "b": b_fc[None, :]}   # (H, O), (1, O)
    return params


# ------------------------- Pure-JAX reference check -------------------------- #

def _reference_forward(x_bti, params, num_layers):
    seq = x_bti
    B = x_bti.shape[0]
    for layer in range(num_layers):
        p = params["lstm"][layer]
        H = p["w_hh_t"].shape[0]

        def step(carry, x_t, p=p, H=H):
            h, c = carry
            gates = x_t @ p["w_ih_t"] + h @ p["w_hh_t"] + p["b"][0]
            i = jax.nn.sigmoid(gates[:, 0 * H:1 * H])
            f = jax.nn.sigmoid(gates[:, 1 * H:2 * H])
            g = jnp.tanh(gates[:, 2 * H:3 * H])
            o = jax.nn.sigmoid(gates[:, 3 * H:4 * H])
            c = f * c + i * g
            h = o * jnp.tanh(c)
            return (h, c), h

        init = (jnp.zeros((B, H), jnp.float32), jnp.zeros((B, H), jnp.float32))
        _, ys = jax.lax.scan(step, init, jnp.transpose(seq, (1, 0, 2)))
        seq = jnp.transpose(ys, (1, 0, 2))
    logits = seq[:, -1, :] @ params["fc"]["w_t"] + params["fc"]["b"][0]
    return jax.nn.softmax(logits, axis=1)


# ------------------------------------ Main ----------------------------------- #

if __name__ == "__main__":
    input_size, hidden_size, output_size, num_layers = 16, 32, 8, 2
    batch, seq_len = 2, 8

    key = jax.random.PRNGKey(0)
    key, kx = jax.random.split(key)
    x = jax.random.normal(kx, (batch, seq_len, input_size), jnp.float32)

    params = init_params(key, input_size, hidden_size, output_size, num_layers)

    out = lstm_model_2d_forward(x, params, num_layers)
    out = jax.block_until_ready(out)

    ref = _reference_forward(x, params, num_layers)
    np.testing.assert_allclose(np.asarray(out), np.asarray(ref), rtol=1e-5, atol=1e-5)
    assert out.shape == (batch, output_size)
    np.testing.assert_allclose(np.asarray(out).sum(axis=1), np.ones(batch), rtol=1e-5)

    print("KERNEL_OK")
</pallas_src>

<mosaic_0001>
module attributes {stable_mosaic.version = 11 : i64} {
  func.func @kernel(%arg0: memref<64x16xf32, #tpu.memory_space<vmem>>, %arg1: memref<16x128xf32, #tpu.memory_space<vmem>>, %arg2: memref<32x128xf32, #tpu.memory_space<vmem>>, %arg3: memref<1x128xf32, #tpu.memory_space<vmem>>, %arg4: memref<32x128xf32, #tpu.memory_space<vmem>>, %arg5: memref<32x128xf32, #tpu.memory_space<vmem>>, %arg6: memref<1x128xf32, #tpu.memory_space<vmem>>, %arg7: memref<32x8xf32, #tpu.memory_space<vmem>>, %arg8: memref<1x8xf32, #tpu.memory_space<vmem>>, %arg9: memref<8x8xf32, #tpu.memory_space<vmem>>, %arg10: memref<64x32xf32, #tpu.memory_space<vmem>>) attributes {dimension_semantics = [], scalar_prefetch = 0 : i64, scratch_operands = 1 : i64, tpu.core_type = #tpu.core_type<tc>} {
    %c0 = arith.constant 0 : index
    %c0_0 = arith.constant 0 : index
    %0 = vector.load %arg1[%c0, %c0_0] : memref<16x128xf32, #tpu.memory_space<vmem>>, vector<16x128xf32>
    %c0_1 = arith.constant 0 : index
    %c0_2 = arith.constant 0 : index
    %1 = vector.load %arg2[%c0_1, %c0_2] : memref<32x128xf32, #tpu.memory_space<vmem>>, vector<32x128xf32>
    %c0_3 = arith.constant 0 : index
    %c0_4 = arith.constant 0 : index
    %2 = vector.load %arg3[%c0_3, %c0_4] : memref<1x128xf32, #tpu.memory_space<vmem>>, vector<1x128xf32>
    %c0_5 = arith.constant 0 : index
    %c0_6 = arith.constant 0 : index
    %3 = vector.load %arg0[%c0_5, %c0_6] : memref<64x16xf32, #tpu.memory_space<vmem>>, vector<64x16xf32>
    %cst = arith.constant dense<0.000000e+00> : vector<64x128xf32>
    %4 = tpu.matmul %3, %0, %cst {dimension_numbers = #tpu.dot_dimension_numbers<[1], [0], [0], [1], [0, 0, 1, 1], [], []>} : vector<64x16xf32>, vector<16x128xf32>, vector<64x128xf32> -> vector<64x128xf32>
    %5 = vector.broadcast %2 : vector<1x128xf32> to vector<64x128xf32>
    %6 = arith.addf %4, %5 : vector<64x128xf32>
    %cst_7 = arith.constant 0.000000e+00 : f32
    %7 = vector.broadcast %cst_7 : f32 to vector<8x32xf32>
    %cst_8 = arith.constant 0.000000e+00 : f32
    %8 = vector.broadcast %cst_8 : f32 to vector<8x32xf32>
    %9 = vector.extract_strided_slice %6 {offsets = [0, 0], sizes = [8, 128], strides = [1, 1]} : vector<64x128xf32> to vector<8x128xf32>
    %cst_9 = arith.constant dense<0.000000e+00> : vector<8x128xf32>
    %10 = tpu.matmul %7, %1, %cst_9 {dimension_numbers = #tpu.dot_dimension_numbers<[1], [0], [0], [1], [0, 0, 1, 1], [], []>} : vector<8x32xf32>, vector<32x128xf32>, vector<8x128xf32> -> vector<8x128xf32>
    %11 = arith.addf %9, %10 : vector<8x128xf32>
    %12 = vector.extract_strided_slice %11 {offsets = [0, 0], sizes = [8, 32], strides = [1, 1]} : vector<8x128xf32> to vector<8x32xf32>
    %13 = arith.negf %12 : vector<8x32xf32>
    %14 = math.exp %13 : vector<8x32xf32>
    %cst_10 = arith.constant 1.000000e+00 : f32
    %15 = vector.broadcast %cst_10 : f32 to vector<8x32xf32>
    %16 = arith.addf %15, %14 : vector<8x32xf32>
    %17 = arith.divf %15, %16 : vector<8x32xf32>
    %18 = vector.extract_strided_slice %11 {offsets = [0, 32], sizes = [8, 32], strides = [1, 1]} : vector<8x128xf32> to vector<8x32xf32>
    %19 = arith.negf %18 : vector<8x32xf32>
    %20 = math.exp %19 : vector<8x32xf32>
    %cst_11 = arith.constant 1.000000e+00 : f32
    %21 = vector.broadcast %cst_11 : f32 to vector<8x32xf32>
    %22 = arith.addf %21, %20 : vector<8x32xf32>
    %23 = arith.divf %21, %22 : vector<8x32xf32>
    %24 = vector.extract_strided_slice %11 {offsets = [0, 64], sizes = [8, 32], strides = [1, 1]} : vector<8x128xf32> to vector<8x32xf32>
    %25 = math.tanh %24 : vector<8x32xf32>
    %26 = vector.extract_strided_slice %11 {offsets = [0, 96], sizes = [8, 32], strides = [1, 1]} : vector<8x128xf32> to vector<8x32xf32>
    %27 = arith.negf %26 : vector<8x32xf32>
    %28 = math.exp %27 : vector<8x32xf32>
    %cst_12 = arith.constant 1.000000e+00 : f32
    %29 = vector.broadcast %cst_12 : f32 to vector<8x32xf32>
    %30 = arith.addf %29, %28 : vector<8x32xf32>
    %31 = arith.divf %29, %30 : vector<8x32xf32>
    %32 = arith.mulf %23, %8 : vector<8x32xf32>
    %33 = arith.mulf %17, %25 : vector<8x32xf32>
    %34 = arith.addf %32, %33 : vector<8x32xf32>
    %35 = math.tanh %34 : vector<8x32xf32>
    %36 = arith.mulf %31, %35 : vector<8x32xf32>
    %c0_13 = arith.constant 0 : index
    %c0_14 = arith.constant 0 : index
    %37 = vector.load %arg10[%c0_13, %c0_14] : memref<64x32xf32, #tpu.memory_space<vmem>>, vector<8x32xf32>
    tpu.vector_store %arg10[%c0_13, %c0_14], %36 {strides = array<i32>} : memref<64x32xf32, #tpu.memory_space<vmem>>, vector<8x32xf32>,
    %38 = vector.extract_strided_slice %6 {offsets = [8, 0], sizes = [8, 128], strides = [1, 1]} : vector<64x128xf32> to vector<8x128xf32>
    %cst_15 = arith.constant dense<0.000000e+00> : vector<8x128xf32>
    %39 = tpu.matmul %36, %1, %cst_15 {dimension_numbers = #tpu.dot_dimension_numbers<[1], [0], [0], [1], [0, 0, 1, 1], [], []>} : vector<8x32xf32>, vector<32x128xf32>, vector<8x128xf32> -> vector<8x128xf32>
    %40 = arith.addf %38, %39 : vector<8x128xf32>
    %41 = vector.extract_strided_slice %40 {offsets = [0, 0], sizes = [8, 32], strides = [1, 1]} : vector<8x128xf32> to vector<8x32xf32>
    %42 = arith.negf %41 : vector<8x32xf32>
    %43 = math.exp %42 : vector<8x32xf32>
    %cst_16 = arith.constant 1.000000e+00 : f32
    %44 = vector.broadcast %cst_16 : f32 to vector<8x32xf32>
    %45 = arith.addf %44, %43 : vector<8x32xf32>
    %46 = arith.divf %44, %45 : vector<8x32xf32>
    %47 = vector.extract_strided_slice %40 {offsets = [0, 32], sizes = [8, 32], strides = [1, 1]} : vector<8x128xf32> to vector<8x32xf32>
    %48 = arith.negf %47 : vector<8x32xf32>
    %49 = math.exp %48 : vector<8x32xf32>
    %cst_17 = arith.constant 1.000000e+00 : f32
    %50 = vector.broadcast %cst_17 : f32 to vector<8x32xf32>
    %51 = arith.addf %50, %49 : vector<8x32xf32>
    %52 = arith.divf %50, %51 : vector<8x32xf32>
    %53 = vector.extract_strided_slice %40 {offsets = [0, 64], sizes = [8, 32], strides = [1, 1]} : vector<8x128xf32> to vector<8x32xf32>
    %54 = math.tanh %53 : vector<8x32xf32>
    %55 = vector.extract_strided_slice %40 {offsets = [0, 96], sizes = [8, 32], strides = [1, 1]} : vector<8x128xf32> to vector<8x32xf32>
    %56 = arith.negf %55 : vector<8x32xf32>
    %57 = math.exp %56 : vector<8x32xf32>
    %cst_18 = arith.constant 1.000000e+00 : f32
    %58 = vector.broadcast %cst_18 : f32 to vector<8x32xf32>
    %59 = arith.addf %58, %57 : vector<8x32xf32>
    %60 = arith.divf %58, %59 : vector<8x32xf32>
    %61 = arith.mulf %52, %34 : vector<8x32xf32>
    %62 = arith.mulf %46, %54 : vector<8x32xf32>
    %63 = arith.addf %61, %62 : vector<8x32xf32>
    %64 = math.tanh %63 : vector<8x32xf32>
    %65 = arith.mulf %60, %64 : vector<8x32xf32>
    %c8 = arith.constant 8 : index
    %c0_19 = arith.constant 0 : index
    %66 = vector.load %arg10[%c8, %c0_19] : memref<64x32xf32, #tpu.memory_space<vmem>>, vector<8x32xf32>
    tpu.vector_store %arg10[%c8, %c0_19], %65 {strides = array<i32>} : memref<64x32xf32, #tpu.memory_space<vmem>>, vector<8x32xf32>,
    %67 = vector.extract_strided_slice %6 {offsets = [16, 0], sizes = [8, 128], strides = [1, 1]} : vector<64x128xf32> to vector<8x128xf32>
    %cst_20 = arith.constant dense<0.000000e+00> : vector<8x128xf32>
    %68 = tpu.matmul %65, %1, %cst_20 {dimension_numbers = #tpu.dot_dimension_numbers<[1], [0], [0], [1], [0, 0, 1, 1], [], []>} : vector<8x32xf32>, vector<32x128xf32>, vector<8x128xf32> -> vector<8x128xf32>
    %69 = arith.addf %67, %68 : vector<8x128xf32>
    %70 = vector.extract_strided_slice %69 {offsets = [0, 0], sizes = [8, 32], strides = [1, 1]} : vector<8x128xf32> to vector<8x32xf32>
    %71 = arith.negf %70 : vector<8x32xf32>
    %72 = math.exp %71 : vector<8x32xf32>
    %cst_21 = arith.constant 1.000000e+00 : f32
    %73 = vector.broadcast %cst_21 : f32 to vector<8x32xf32>
    %74 = arith.addf %73, %72 : vector<8x32xf32>
    %75 = arith.divf %73, %74 : vector<8x32xf32>
    %76 = vector.extract_strided_slice %69 {offsets = [0, 32], sizes = [8, 32], strides = [1, 1]} : vector<8x128xf32> to vector<8x32xf32>
    %77 = arith.negf %76 : vector<8x32xf32>
    %78 = math.exp %77 : vector<8x32xf32>
    %cst_22 = arith.constant 1.000000e+00 : f32
    %79 = vector.broadcast %cst_22 : f32 to vector<8x32xf32>
    %80 = arith.addf %79, %78 : vector<8x32xf32>
    %81 = arith.divf %79, %80 : vector<8x32xf32>
    %82 = vector.extract_strided_slice %69 {offsets = [0, 64], sizes = [8, 32], strides = [1, 1]} : vector<8x128xf32> to vector<8x32xf32>
    %83 = math.tanh %82 : vector<8x32xf32>
    %84 = vector.extract_strided_slice %69 {offsets = [0, 96], sizes = [8, 32], strides = [1, 1]} : vector<8x128xf32> to vector<8x32xf32>
    %85 = arith.negf %84 : vector<8x32xf32>
    %86 = math.exp %85 : vector<8x32xf32>
    %cst_23 = arith.constant 1.000000e+00 : f32
    %87 = vector.broadcast %cst_23 : f32 to vector<8x32xf32>
    %88 = arith.addf %87, %86 : vector<8x32xf32>
    %89 = arith.divf %87, %88 : vector<8x32xf32>
    %90 = arith.mulf %81, %63 : vector<8x32xf32>
    %91 = arith.mulf %75, %83 : vector<8x32xf32>
    %92 = arith.addf %90, %91 : vector<8x32xf32>
    %93 = math.tanh %92 : vector<8x32xf32>
    %94 = arith.mulf %89, %93 : vector<8x32xf32>
    %c16 = arith.constant 16 : index
    %c0_24 = arith.constant 0 : index
    %95 = vector.load %arg10[%c16, %c0_24] : memref<64x32xf32, #tpu.memory_space<vmem>>, vector<8x32xf32>
    tpu.vector_store %arg10[%c16, %c0_24], %94 {strides = array<i32>} : memref<64x32xf32, #tpu.memory_space<vmem>>, vector<8x32xf32>,
    %96 = vector.extract_strided_slice %6 {offsets = [24, 0], sizes = [8, 128], strides = [1, 1]} : vector<64x128xf32> to vector<8x128xf32>
    %cst_25 = arith.constant dense<0.000000e+00> : vector<8x128xf32>
    %97 = tpu.matmul %94, %1, %cst_25 {dimension_numbers = #tpu.dot_dimension_numbers<[1], [0], [0], [1], [0, 0, 1, 1], [], []>} : vector<8x32xf32>, vector<32x128xf32>, vector<8x128xf32> -> vector<8x128xf32>
    %98 = arith.addf %96, %97 : vector<8x128xf32>
    %99 = vector.extract_strided_slice %98 {offsets = [0, 0], sizes = [8, 32], strides = [1, 1]} : vector<8x128xf32> to vector<8x32xf32>
    %100 = arith.negf %99 : vector<8x32xf32>
    %101 = math.exp %100 : vector<8x32xf32>
    %cst_26 = arith.constant 1.000000e+00 : f32
    %102 = vector.broadcast %cst_26 : f32 to vector<8x32xf32>
    %103 = arith.addf %102, %101 : vector<8x32xf32>
    %104 = arith.divf %102, %103 : vector<8x32xf32>
    %105 = vector.extract_strided_slice %98 {offsets = [0, 32], sizes = [8, 32], strides = [1, 1]} : vector<8x128xf32> to vector<8x32xf32>
    %106 = arith.negf %105 : vector<8x32xf32>
    %107 = math.exp %106 : vector<8x32xf32>
    %cst_27 = arith.constant 1.000000e+00 : f32
    %108 = vector.broadcast %cst_27 : f32 to vector<8x32xf32>
    %109 = arith.addf %108, %107 : vector<8x32xf32>
    %110 = arith.divf %108, %109 : vector<8x32xf32>
    %111 = vector.extract_strided_slice %98 {offsets = [0, 64], sizes = [8, 32], strides = [1, 1]} : vector<8x128xf32> to vector<8x32xf32>
    %112 = math.tanh %111 : vector<8x32xf32>
    %113 = vector.extract_strided_slice %98 {offsets = [0, 96], sizes = [8, 32], strides = [1, 1]} : vector<8x128xf32> to vector<8x32xf32>
    %114 = arith.negf %113 : vector<8x32xf32>
    %115 = math.exp %114 : vector<8x32xf32>
    %cst_28 = arith.constant 1.000000e+00 : f32
    %116 = vector.broadcast %cst_28 : f32 to vector<8x32xf32>
    %117 = arith.addf %116, %115 : vector<8x32xf32>
    %118 = arith.divf %116, %117 : vector<8x32xf32>
    %119 = arith.mulf %110, %92 : vector<8x32xf32>
    %120 = arith.mulf %104, %112 : vector<8x32xf32>
    %121 = arith.addf %119, %120 : vector<8x32xf32>
    %122 = math.tanh %121 : vector<8x32xf32>
    %123 = arith.mulf %118, %122 : vector<8x32xf32>
    %c24 = arith.constant 24 : index
    %c0_29 = arith.constant 0 : index
    %124 = vector.load %arg10[%c24, %c0_29] : memref<64x32xf32, #tpu.memory_space<vmem>>, vector<8x32xf32>
    tpu.vector_store %arg10[%c24, %c0_29], %123 {strides = array<i32>} : memref<64x32xf32, #tpu.memory_space<vmem>>, vector<8x32xf32>,
    %125 = vector.extract_strided_slice %6 {offsets = [32, 0], sizes = [8, 128], strides = [1, 1]} : vector<64x128xf32> to vector<8x128xf32>
    %cst_30 = arith.constant dense<0.000000e+00> : vector<8x128xf32>
    %126 = tpu.matmul %123, %1, %cst_30 {dimension_numbers = #tpu.dot_dimension_numbers<[1], [0], [0], [1], [0, 0, 1, 1], [], []>} : vector<8x32xf32>, vector<32x128xf32>, vector<8x128xf32> -> vector<8x128xf32>
    %127 = arith.addf %125, %126 : vector<8x128xf32>
    %128 = vector.extract_strided_slice %127 {offsets = [0, 0], sizes = [8, 32], strides = [1, 1]} : vector<8x128xf32> to vector<8x32xf32>
    %129 = arith.negf %128 : vector<8x32xf32>
    %130 = math.exp %129 : vector<8x32xf32>
    %cst_31 = arith.constant 1.000000e+00 : f32
    %131 = vector.broadcast %cst_31 : f32 to vector<8x32xf32>
    %132 = arith.addf %131, %130 : vector<8x32xf32>
    %133 = arith.divf %131, %132 : vector<8x32xf32>
    %134 = vector.extract_strided_slice %127 {offsets = [0, 32], sizes = [8, 32], strides = [1, 1]} : vector<8x128xf32> to vector<8x32xf32>
    %135 = arith.negf %134 : vector<8x32xf32>
    %136 = math.exp %135 : vector<8x32xf32>
    %cst_32 = arith.constant 1.000000e+00 : f32
    %137 = vector.broadcast %cst_32 : f32 to vector<8x32xf32>
    %138 = arith.addf %137, %136 : vector<8x32xf32>
    %139 = arith.divf %137, %138 : vector<8x32xf32>
    %140 = vector.extract_strided_slice %127 {offsets = [0, 64], sizes = [8, 32], strides = [1, 1]} : vector<8x128xf32> to vector<8x32xf32>
    %141 = math.tanh %140 : vector<8x32xf32>
    %142 = vector.extract_strided_slice %127 {offsets = [0, 96], sizes = [8, 32], strides = [1, 1]} : vector<8x128xf32> to vector<8x32xf32>
    %143 = arith.negf %142 : vector<8x32xf32>
    %144 = math.exp %143 : vector<8x32xf32>
    %cst_33 = arith.constant 1.000000e+00 : f32
    %145 = vector.broadcast %cst_33 : f32 to vector<8x32xf32>
    %146 = arith.addf %145, %144 : vector<8x32xf32>
    %147 = arith.divf %145, %146 : vector<8x32xf32>
    %148 = arith.mulf %139, %121 : vector<8x32xf32>
    %149 = arith.mulf %133, %141 : vector<8x32xf32>
    %150 = arith.addf %148, %149 : vector<8x32xf32>
    %151 = math.tanh %150 : vector<8x32xf32>
    %152 = arith.mulf %147, %151 : vector<8x32xf32>
    %c32 = arith.constant 32 : index
    %c0_34 = arith.constant 0 : index
    %153 = vector.load %arg10[%c32, %c0_34] : memref<64x32xf32, #tpu.memory_space<vmem>>, vector<8x32xf32>
    tpu.vector_store %arg10[%c32, %c0_34], %152 {strides = array<i32>} : memref<64x32xf32, #tpu.memory_space<vmem>>, vector<8x32xf32>,
    %154 = vector.extract_strided_slice %6 {offsets = [40, 0], sizes = [8, 128], strides = [1, 1]} : vector<64x128xf32> to vector<8x128xf32>
    %cst_35 = arith.constant dense<0.000000e+00> : vector<8x128xf32>
    %155 = tpu.matmul %152, %1, %cst_35 {dimension_numbers = #tpu.dot_dimension_numbers<[1], [0], [0], [1], [0, 0, 1, 1], [], []>} : vector<8x32xf32>, vector<32x128xf32>, vector<8x128xf32> -> vector<8x128xf32>
    %156 = arith.addf %154, %155 : vector<8x128xf32>
    %157 = vector.extract_strided_slice %156 {offsets = [0, 0], sizes = [8, 32], strides = [1, 1]} : vector<8x128xf32> to vector<8x32xf32>
    %158 = arith.negf %157 : vector<8x32xf32>
    %159 = math.exp %158 : vector<8x32xf32>
    %cst_36 = arith.constant 1.000000e+00 : f32
    %160 = vector.broadcast %cst_36 : f32 to vector<8x32xf32>
    %161 = arith.addf %160, %159 : vector<8x32xf32>
    %162 = arith.divf %160, %161 : vector<8x32xf32>
    %163 = vector.extract_strided_slice %156 {offsets = [0, 32], sizes = [8, 32], strides = [1, 1]} : vector<8x128xf32> to vector<8x32xf32>
    %164 = arith.negf %163 : vector<8x32xf32>
    %165 = math.exp %164 : vector<8x32xf32>
    %cst_37 = arith.constant 1.000000e+00 : f32
    %166 = vector.broadcast %cst_37 : f32 to vector<8x32xf32>
    %167 = arith.addf %166, %165 : vector<8x32xf32>
    %168 = arith.divf %166, %167 : vector<8x32xf32>
    %169 = vector.extract_strided_slice %156 {offsets = [0, 64], sizes = [8, 32], strides = [1, 1]} : vector<8x128xf32> to vector<8x32xf32>
    %170 = math.tanh %169 : vector<8x32xf32>
    %171 = vector.extract_strided_slice %156 {offsets = [0, 96], sizes = [8, 32], strides = [1, 1]} : vector<8x128xf32> to vector<8x32xf32>
    %172 = arith.negf %171 : vector<8x32xf32>
    %173 = math.exp %172 : vector<8x32xf32>
    %cst_38 = arith.constant 1.000000e+00 : f32
    %174 = vector.broadcast %cst_38 : f32 to vector<8x32xf32>
    %175 = arith.addf %174, %173 : vector<8x32xf32>
    %176 = arith.divf %174, %175 : vector<8x32xf32>
    %177 = arith.mulf %168, %150 : vector<8x32xf32>
    %178 = arith.mulf %162, %170 : vector<8x32xf32>
    %179 = arith.addf %177, %178 : vector<8x32xf32>
    %180 = math.tanh %179 : vector<8x32xf32>
    %181 = arith.mulf %176, %180 : vector<8x32xf32>
    %c40 = arith.constant 40 : index
    %c0_39 = arith.constant 0 : index
    %182 = vector.load %arg10[%c40, %c0_39] : memref<64x32xf32, #tpu.memory_space<vmem>>, vector<8x32xf32>
    tpu.vector_store %arg10[%c40, %c0_39], %181 {strides = array<i32>} : memref<64x32xf32, #tpu.memory_space<vmem>>, vector<8x32xf32>,
    %183 = vector.extract_strided_slice %6 {offsets = [48, 0], sizes = [8, 128], strides = [1, 1]} : vector<64x128xf32> to vector<8x128xf32>
    %cst_40 = arith.constant dense<0.000000e+00> : vector<8x128xf32>
    %184 = tpu.matmul %181, %1, %cst_40 {dimension_numbers = #tpu.dot_dimension_numbers<[1], [0], [0], [1], [0, 0, 1, 1], [], []>} : vector<8x32xf32>, vector<32x128xf32>, vector<8x128xf32> -> vector<8x128xf32>
    %185 = arith.addf %183, %184 : vector<8x128xf32>
    %186 = vector.extract_strided_slice %185 {offsets = [0, 0], sizes = [8, 32], strides = [1, 1]} : vector<8x128xf32> to vector<8x32xf32>
    %187 = arith.negf %186 : vector<8x32xf32>
    %188 = math.exp %187 : vector<8x32xf32>
    %cst_41 = arith.constant 1.000000e+00 : f32
    %189 = vector.broadcast %cst_41 : f32 to vector<8x32xf32>
    %190 = arith.addf %189, %188 : vector<8x32xf32>
    %191 = arith.divf %189, %190 : vector<8x32xf32>
    %192 = vector.extract_strided_slice %185 {offsets = [0, 32], sizes = [8, 32], strides = [1, 1]} : vector<8x128xf32> to vector<8x32xf32>
    %193 = arith.negf %192 : vector<8x32xf32>
    %194 = math.exp %193 : vector<8x32xf32>
    %cst_42 = arith.constant 1.000000e+00 : f32
    %195 = vector.broadcast %cst_42 : f32 to vector<8x32xf32>
    %196 = arith.addf %195, %194 : vector<8x32xf32>
    %197 = arith.divf %195, %196 : vector<8x32xf32>
    %198 = vector.extract_strided_slice %185 {offsets = [0, 64], sizes = [8, 32], strides = [1, 1]} : vector<8x128xf32> to vector<8x32xf32>
    %199 = math.tanh %198 : vector<8x32xf32>
    %200 = vector.extract_strided_slice %185 {offsets = [0, 96], sizes = [8, 32], strides = [1, 1]} : vector<8x128xf32> to vector<8x32xf32>
    %201 = arith.negf %200 : vector<8x32xf32>
    %202 = math.exp %201 : vector<8x32xf32>
    %cst_43 = arith.constant 1.000000e+00 : f32
    %203 = vector.broadcast %cst_43 : f32 to vector<8x32xf32>
    %204 = arith.addf %203, %202 : vector<8x32xf32>
    %205 = arith.divf %203, %204 : vector<8x32xf32>
    %206 = arith.mulf %197, %179 : vector<8x32xf32>
    %207 = arith.mulf %191, %199 : vector<8x32xf32>
    %208 = arith.addf %206, %207 : vector<8x32xf32>
    %209 = math.tanh %208 : vector<8x32xf32>
    %210 = arith.mulf %205, %209 : vector<8x32xf32>
    %c48 = arith.constant 48 : index
    %c0_44 = arith.constant 0 : index
    %211 = vector.load %arg10[%c48, %c0_44] : memref<64x32xf32, #tpu.memory_space<vmem>>, vector<8x32xf32>
    tpu.vector_store %arg10[%c48, %c0_44], %210 {strides = array<i32>} : memref<64x32xf32, #tpu.memory_space<vmem>>, vector<8x32xf32>,
    %212 = vector.extract_strided_slice %6 {offsets = [56, 0], sizes = [8, 128], strides = [1, 1]} : vector<64x128xf32> to vector<8x128xf32>
    %cst_45 = arith.constant dense<0.000000e+00> : vector<8x128xf32>
    %213 = tpu.matmul %210, %1, %cst_45 {dimension_numbers = #tpu.dot_dimension_numbers<[1], [0], [0], [1], [0, 0, 1, 1], [], []>} : vector<8x32xf32>, vector<32x128xf32>, vector<8x128xf32> -> vector<8x128xf32>
    %214 = arith.addf %212, %213 : vector<8x128xf32>
    %215 = vector.extract_strided_slice %214 {offsets = [0, 0], sizes = [8, 32], strides = [1, 1]} : vector<8x128xf32> to vector<8x32xf32>
    %216 = arith.negf %215 : vector<8x32xf32>
    %217 = math.exp %216 : vector<8x32xf32>
    %cst_46 = arith.constant 1.000000e+00 : f32
    %218 = vector.broadcast %cst_46 : f32 to vector<8x32xf32>
    %219 = arith.addf %218, %217 : vector<8x32xf32>
    %220 = arith.divf %218, %219 : vector<8x32xf32>
    %221 = vector.extract_strided_slice %214 {offsets = [0, 32], sizes = [8, 32], strides = [1, 1]} : vector<8x128xf32> to vector<8x32xf32>
    %222 = arith.negf %221 : vector<8x32xf32>
    %223 = math.exp %222 : vector<8x32xf32>
    %cst_47 = arith.constant 1.000000e+00 : f32
    %224 = vector.broadcast %cst_47 : f32 to vector<8x32xf32>
    %225 = arith.addf %224, %223 : vector<8x32xf32>
    %226 = arith.divf %224, %225 : vector<8x32xf32>
    %227 = vector.extract_strided_slice %214 {offsets = [0, 64], sizes = [8, 32], strides = [1, 1]} : vector<8x128xf32> to vector<8x32xf32>
    %228 = math.tanh %227 : vector<8x32xf32>
    %229 = vector.extract_strided_slice %214 {offsets = [0, 96], sizes = [8, 32], strides = [1, 1]} : vector<8x128xf32> to vector<8x32xf32>
    %230 = arith.negf %229 : vector<8x32xf32>
    %231 = math.exp %230 : vector<8x32xf32>
    %cst_48 = arith.constant 1.000000e+00 : f32
    %232 = vector.broadcast %cst_48 : f32 to vector<8x32xf32>
    %233 = arith.addf %232, %231 : vector<8x32xf32>
    %234 = arith.divf %232, %233 : vector<8x32xf32>
    %235 = arith.mulf %226, %208 : vector<8x32xf32>
    %236 = arith.mulf %220, %228 : vector<8x32xf32>
    %237 = arith.addf %235, %236 : vector<8x32xf32>
    %238 = math.tanh %237 : vector<8x32xf32>
    %239 = arith.mulf %234, %238 : vector<8x32xf32>
    %c56 = arith.constant 56 : index
    %c0_49 = arith.constant 0 : index
    %240 = vector.load %arg10[%c56, %c0_49] : memref<64x32xf32, #tpu.memory_space<vmem>>, vector<8x32xf32>
    tpu.vector_store %arg10[%c56, %c0_49], %239 {strides = array<i32>} : memref<64x32xf32, #tpu.memory_space<vmem>>, vector<8x32xf32>,
    %c0_50 = arith.constant 0 : index
    %c0_51 = arith.constant 0 : index
    %241 = vector.load %arg4[%c0_50, %c0_51] : memref<32x128xf32, #tpu.memory_space<vmem>>, vector<32x128xf32>
    %c0_52 = arith.constant 0 : index
    %c0_53 = arith.constant 0 : index
    %242 = vector.load %arg5[%c0_52, %c0_53] : memref<32x128xf32, #tpu.memory_space<vmem>>, vector<32x128xf32>
    %c0_54 = arith.constant 0 : index
    %c0_55 = arith.constant 0 : index
    %243 = vector.load %arg6[%c0_54, %c0_55] : memref<1x128xf32, #tpu.memory_space<vmem>>, vector<1x128xf32>
    %c0_56 = arith.constant 0 : index
    %c0_57 = arith.constant 0 : index
    %244 = vector.load %arg10[%c0_56, %c0_57] : memref<64x32xf32, #tpu.memory_space<vmem>>, vector<64x32xf32>
    %cst_58 = arith.constant dense<0.000000e+00> : vector<64x128xf32>
    %245 = tpu.matmul %244, %241, %cst_58 {dimension_numbers = #tpu.dot_dimension_numbers<[1], [0], [0], [1], [0, 0, 1, 1], [], []>} : vector<64x32xf32>, vector<32x128xf32>, vector<64x128xf32> -> vector<64x128xf32>
    %246 = vector.broadcast %243 : vector<1x128xf32> to vector<64x128xf32>
    %247 = arith.addf %245, %246 : vector<64x128xf32>
    %cst_59 = arith.constant 0.000000e+00 : f32
    %248 = vector.broadcast %cst_59 : f32 to vector<8x32xf32>
    %cst_60 = arith.constant 0.000000e+00 : f32
    %249 = vector.broadcast %cst_60 : f32 to vector<8x32xf32>
    %250 = vector.extract_strided_slice %247 {offsets = [0, 0], sizes = [8, 128], strides = [1, 1]} : vector<64x128xf32> to vector<8x128xf32>
    %cst_61 = arith.constant dense<0.000000e+00> : vector<8x128xf32>
    %251 = tpu.matmul %248, %242, %cst_61 {dimension_numbers = #tpu.dot_dimension_numbers<[1], [0], [0], [1], [0, 0, 1, 1], [], []>} : vector<8x32xf32>, vector<32x128xf32>, vector<8x128xf32> -> vector<8x128xf32>
    %252 = arith.addf %250, %251 : vector<8x128xf32>
    %253 = vector.extract_strided_slice %252 {offsets = [0, 0], sizes = [8, 32], strides = [1, 1]} : vector<8x128xf32> to vector<8x32xf32>
    %254 = arith.negf %253 : vector<8x32xf32>
    %255 = math.exp %254 : vector<8x32xf32>
    %cst_62 = arith.constant 1.000000e+00 : f32
    %256 = vector.broadcast %cst_62 : f32 to vector<8x32xf32>
    %257 = arith.addf %256, %255 : vector<8x32xf32>
    %258 = arith.divf %256, %257 : vector<8x32xf32>
    %259 = vector.extract_strided_slice %252 {offsets = [0, 32], sizes = [8, 32], strides = [1, 1]} : vector<8x128xf32> to vector<8x32xf32>
    %260 = arith.negf %259 : vector<8x32xf32>
    %261 = math.exp %260 : vector<8x32xf32>
    %cst_63 = arith.constant 1.000000e+00 : f32
    %262 = vector.broadcast %cst_63 : f32 to vector<8x32xf32>
    %263 = arith.addf %262, %261 : vector<8x32xf32>
    %264 = arith.divf %262, %263 : vector<8x32xf32>
    %265 = vector.extract_strided_slice %252 {offsets = [0, 64], sizes = [8, 32], strides = [1, 1]} : vector<8x128xf32> to vector<8x32xf32>
    %266 = math.tanh %265 : vector<8x32xf32>
    %267 = vector.extract_strided_slice %252 {offsets = [0, 96], sizes = [8, 32], strides = [1, 1]} : vector<8x128xf32> to vector<8x32xf32>
    %268 = arith.negf %267 : vector<8x32xf32>
    %269 = math.exp %268 : vector<8x32xf32>
    %cst_64 = arith.constant 1.000000e+00 : f32
    %270 = vector.broadcast %cst_64 : f32 to vector<8x32xf32>
    %271 = arith.addf %270, %269 : vector<8x32xf32>
    %272 = arith.divf %270, %271 : vector<8x32xf32>
    %273 = arith.mulf %264, %249 : vector<8x32xf32>
    %274 = arith.mulf %258, %266 : vector<8x32xf32>
    %275 = arith.addf %273, %274 : vector<8x32xf32>
    %276 = math.tanh %275 : vector<8x32xf32>
    %277 = arith.mulf %272, %276 : vector<8x32xf32>
    %278 = vector.extract_strided_slice %247 {offsets = [8, 0], sizes = [8, 128], strides = [1, 1]} : vector<64x128xf32> to vector<8x128xf32>
    %cst_65 = arith.constant dense<0.000000e+00> : vector<8x128xf32>
    %279 = tpu.matmul %277, %242, %cst_65 {dimension_numbers = #tpu.dot_dimension_numbers<[1], [0], [0], [1], [0, 0, 1, 1], [], []>} : vector<8x32xf32>, vector<32x128xf32>, vector<8x128xf32> -> vector<8x128xf32>
    %280 = arith.addf %278, %279 : vector<8x128xf32>
    %281 = vector.extract_strided_slice %280 {offsets = [0, 0], sizes = [8, 32], strides = [1, 1]} : vector<8x128xf32> to vector<8x32xf32>
    %282 = arith.negf %281 : vector<8x32xf32>
    %283 = math.exp %282 : vector<8x32xf32>
    %cst_66 = arith.constant 1.000000e+00 : f32
    %284 = vector.broadcast %cst_66 : f32 to vector<8x32xf32>
    %285 = arith.addf %284, %283 : vector<8x32xf32>
    %286 = arith.divf %284, %285 : vector<8x32xf32>
    %287 = vector.extract_strided_slice %280 {offsets = [0, 32], sizes = [8, 32], strides = [1, 1]} : vector<8x128xf32> to vector<8x32xf32>
    %288 = arith.negf %287 : vector<8x32xf32>
    %289 = math.exp %288 : vector<8x32xf32>
    %cst_67 = arith.constant 1.000000e+00 : f32
    %290 = vector.broadcast %cst_67 : f32 to vector<8x32xf32>
    %291 = arith.addf %290, %289 : vector<8x32xf32>
    %292 = arith.divf %290, %291 : vector<8x32xf32>
    %293 = vector.extract_strided_slice %280 {offsets = [0, 64], sizes = [8, 32], strides = [1, 1]} : vector<8x128xf32> to vector<8x32xf32>
    %294 = math.tanh %293 : vector<8x32xf32>
    %295 = vector.extract_strided_slice %280 {offsets = [0, 96], sizes = [8, 32], strides = [1, 1]} : vector<8x128xf32> to vector<8x32xf32>
    %296 = arith.negf %295 : vector<8x32xf32>
    %297 = math.exp %296 : vector<8x32xf32>
    %cst_68 = arith.constant 1.000000e+00 : f32
    %298 = vector.broadcast %cst_68 : f32 to vector<8x32xf32>
    %299 = arith.addf %298, %297 : vector<8x32xf32>
    %300 = arith.divf %298, %299 : vector<8x32xf32>
    %301 = arith.mulf %292, %275 : vector<8x32xf32>
    %302 = arith.mulf %286, %294 : vector<8x32xf32>
    %303 = arith.addf %301, %302 : vector<8x32xf32>
    %304 = math.tanh %303 : vector<8x32xf32>
    %305 = arith.mulf %300, %304 : vector<8x32xf32>
    %306 = vector.extract_strided_slice %247 {offsets = [16, 0], sizes = [8, 128], strides = [1, 1]} : vector<64x128xf32> to vector<8x128xf32>
    %cst_69 = arith.constant dense<0.000000e+00> : vector<8x128xf32>
    %307 = tpu.matmul %305, %242, %cst_69 {dimension_numbers = #tpu.dot_dimension_numbers<[1], [0], [0], [1], [0, 0, 1, 1], [], []>} : vector<8x32xf32>, vector<32x128xf32>, vector<8x128xf32> -> vector<8x128xf32>
    %308 = arith.addf %306, %307 : vector<8x128xf32>
    %309 = vector.extract_strided_slice %308 {offsets = [0, 0], sizes = [8, 32], strides = [1, 1]} : vector<8x128xf32> to vector<8x32xf32>
    %310 = arith.negf %309 : vector<8x32xf32>
    %311 = math.exp %310 : vector<8x32xf32>
    %cst_70 = arith.constant 1.000000e+00 : f32
    %312 = vector.broadcast %cst_70 : f32 to vector<8x32xf32>
    %313 = arith.addf %312, %311 : vector<8x32xf32>
    %314 = arith.divf %312, %313 : vector<8x32xf32>
    %315 = vector.extract_strided_slice %308 {offsets = [0, 32], sizes = [8, 32], strides = [1, 1]} : vector<8x128xf32> to vector<8x32xf32>
    %316 = arith.negf %315 : vector<8x32xf32>
    %317 = math.exp %316 : vector<8x32xf32>
    %cst_71 = arith.constant 1.000000e+00 : f32
    %318 = vector.broadcast %cst_71 : f32 to vector<8x32xf32>
    %319 = arith.addf %318, %317 : vector<8x32xf32>
    %320 = arith.divf %318, %319 : vector<8x32xf32>
    %321 = vector.extract_strided_slice %308 {offsets = [0, 64], sizes = [8, 32], strides = [1, 1]} : vector<8x128xf32> to vector<8x32xf32>
    %322 = math.tanh %321 : vector<8x32xf32>
    %323 = vector.extract_strided_slice %308 {offsets = [0, 96], sizes = [8, 32], strides = [1, 1]} : vector<8x128xf32> to vector<8x32xf32>
    %324 = arith.negf %323 : vector<8x32xf32>
    %325 = math.exp %324 : vector<8x32xf32>
    %cst_72 = arith.constant 1.000000e+00 : f32
    %326 = vector.broadcast %cst_72 : f32 to vector<8x32xf32>
    %327 = arith.addf %326, %325 : vector<8x32xf32>
    %328 = arith.divf %326, %327 : vector<8x32xf32>
    %329 = arith.mulf %320, %303 : vector<8x32xf32>
    %330 = arith.mulf %314, %322 : vector<8x32xf32>
    %331 = arith.addf %329, %330 : vector<8x32xf32>
    %332 = math.tanh %331 : vector<8x32xf32>
    %333 = arith.mulf %328, %332 : vector<8x32xf32>
    %334 = vector.extract_strided_slice %247 {offsets = [24, 0], sizes = [8, 128], strides = [1, 1]} : vector<64x128xf32> to vector<8x128xf32>
    %cst_73 = arith.constant dense<0.000000e+00> : vector<8x128xf32>
    %335 = tpu.matmul %333, %242, %cst_73 {dimension_numbers = #tpu.dot_dimension_numbers<[1], [0], [0], [1], [0, 0, 1, 1], [], []>} : vector<8x32xf32>, vector<32x128xf32>, vector<8x128xf32> -> vector<8x128xf32>
    %336 = arith.addf %334, %335 : vector<8x128xf32>
    %337 = vector.extract_strided_slice %336 {offsets = [0, 0], sizes = [8, 32], strides = [1, 1]} : vector<8x128xf32> to vector<8x32xf32>
    %338 = arith.negf %337 : vector<8x32xf32>
    %339 = math.exp %338 : vector<8x32xf32>
    %cst_74 = arith.constant 1.000000e+00 : f32
    %340 = vector.broadcast %cst_74 : f32 to vector<8x32xf32>
    %341 = arith.addf %340, %339 : vector<8x32xf32>
    %342 = arith.divf %340, %341 : vector<8x32xf32>
    %343 = vector.extract_strided_slice %336 {offsets = [0, 32], sizes = [8, 32], strides = [1, 1]} : vector<8x128xf32> to vector<8x32xf32>
    %344 = arith.negf %343 : vector<8x32xf32>
    %345 = math.exp %344 : vector<8x32xf32>
    %cst_75 = arith.constant 1.000000e+00 : f32
    %346 = vector.broadcast %cst_75 : f32 to vector<8x32xf32>
    %347 = arith.addf %346, %345 : vector<8x32xf32>
    %348 = arith.divf %346, %347 : vector<8x32xf32>
    %349 = vector.extract_strided_slice %336 {offsets = [0, 64], sizes = [8, 32], strides = [1, 1]} : vector<8x128xf32> to vector<8x32xf32>
    %350 = math.tanh %349 : vector<8x32xf32>
    %351 = vector.extract_strided_slice %336 {offsets = [0, 96], sizes = [8, 32], strides = [1, 1]} : vector<8x128xf32> to vector<8x32xf32>
    %352 = arith.negf %351 : vector<8x32xf32>
    %353 = math.exp %352 : vector<8x32xf32>
    %cst_76 = arith.constant 1.000000e+00 : f32
    %354 = vector.broadcast %cst_76 : f32 to vector<8x32xf32>
    %355 = arith.addf %354, %353 : vector<8x32xf32>
    %356 = arith.divf %354, %355 : vector<8x32xf32>
    %357 = arith.mulf %348, %331 : vector<8x32xf32>
    %358 = arith.mulf %342, %350 : vector<8x32xf32>
    %359 = arith.addf %357, %358 : vector<8x32xf32>
    %360 = math.tanh %359 : vector<8x32xf32>
    %361 = arith.mulf %356, %360 : vector<8x32xf32>
    %362 = vector.extract_strided_slice %247 {offsets = [32, 0], sizes = [8, 128], strides = [1, 1]} : vector<64x128xf32> to vector<8x128xf32>
    %cst_77 = arith.constant dense<0.000000e+00> : vector<8x128xf32>
    %363 = tpu.matmul %361, %242, %cst_77 {dimension_numbers = #tpu.dot_dimension_numbers<[1], [0], [0], [1], [0, 0, 1, 1], [], []>} : vector<8x32xf32>, vector<32x128xf32>, vector<8x128xf32> -> vector<8x128xf32>
    %364 = arith.addf %362, %363 : vector<8x128xf32>
    %365 = vector.extract_strided_slice %364 {offsets = [0, 0], sizes = [8, 32], strides = [1, 1]} : vector<8x128xf32> to vector<8x32xf32>
    %366 = arith.negf %365 : vector<8x32xf32>
    %367 = math.exp %366 : vector<8x32xf32>
    %cst_78 = arith.constant 1.000000e+00 : f32
    %368 = vector.broadcast %cst_78 : f32 to vector<8x32xf32>
    %369 = arith.addf %368, %367 : vector<8x32xf32>
    %370 = arith.divf %368, %369 : vector<8x32xf32>
    %371 = vector.extract_strided_slice %364 {offsets = [0, 32], sizes = [8, 32], strides = [1, 1]} : vector<8x128xf32> to vector<8x32xf32>
    %372 = arith.negf %371 : vector<8x32xf32>
    %373 = math.exp %372 : vector<8x32xf32>
    %cst_79 = arith.constant 1.000000e+00 : f32
    %374 = vector.broadcast %cst_79 : f32 to vector<8x32xf32>
    %375 = arith.addf %374, %373 : vector<8x32xf32>
    %376 = arith.divf %374, %375 : vector<8x32xf32>
    %377 = vector.extract_strided_slice %364 {offsets = [0, 64], sizes = [8, 32], strides = [1, 1]} : vector<8x128xf32> to vector<8x32xf32>
    %378 = math.tanh %377 : vector<8x32xf32>
    %379 = vector.extract_strided_slice %364 {offsets = [0, 96], sizes = [8, 32], strides = [1, 1]} : vector<8x128xf32> to vector<8x32xf32>
    %380 = arith.negf %379 : vector<8x32xf32>
    %381 = math.exp %380 : vector<8x32xf32>
    %cst_80 = arith.constant 1.000000e+00 : f32
    %382 = vector.broadcast %cst_80 : f32 to vector<8x32xf32>
    %383 = arith.addf %382, %381 : vector<8x32xf32>
    %384 = arith.divf %382, %383 : vector<8x32xf32>
    %385 = arith.mulf %376, %359 : vector<8x32xf32>
    %386 = arith.mulf %370, %378 : vector<8x32xf32>
    %387 = arith.addf %385, %386 : vector<8x32xf32>
    %388 = math.tanh %387 : vector<8x32xf32>
    %389 = arith.mulf %384, %388 : vector<8x32xf32>
    %390 = vector.extract_strided_slice %247 {offsets = [40, 0], sizes = [8, 128], strides = [1, 1]} : vector<64x128xf32> to vector<8x128xf32>
    %cst_81 = arith.constant dense<0.000000e+00> : vector<8x128xf32>
    %391 = tpu.matmul %389, %242, %cst_81 {dimension_numbers = #tpu.dot_dimension_numbers<[1], [0], [0], [1], [0, 0, 1, 1], [], []>} : vector<8x32xf32>, vector<32x128xf32>, vector<8x128xf32> -> vector<8x128xf32>
    %392 = arith.addf %390, %391 : vector<8x128xf32>
    %393 = vector.extract_strided_slice %392 {offsets = [0, 0], sizes = [8, 32], strides = [1, 1]} : vector<8x128xf32> to vector<8x32xf32>
    %394 = arith.negf %393 : vector<8x32xf32>
    %395 = math.exp %394 : vector<8x32xf32>
    %cst_82 = arith.constant 1.000000e+00 : f32
    %396 = vector.broadcast %cst_82 : f32 to vector<8x32xf32>
    %397 = arith.addf %396, %395 : vector<8x32xf32>
    %398 = arith.divf %396, %397 : vector<8x32xf32>
    %399 = vector.extract_strided_slice %392 {offsets = [0, 32], sizes = [8, 32], strides = [1, 1]} : vector<8x128xf32> to vector<8x32xf32>
    %400 = arith.negf %399 : vector<8x32xf32>
    %401 = math.exp %400 : vector<8x32xf32>
    %cst_83 = arith.constant 1.000000e+00 : f32
    %402 = vector.broadcast %cst_83 : f32 to vector<8x32xf32>
    %403 = arith.addf %402, %401 : vector<8x32xf32>
    %404 = arith.divf %402, %403 : vector<8x32xf32>
    %405 = vector.extract_strided_slice %392 {offsets = [0, 64], sizes = [8, 32], strides = [1, 1]} : vector<8x128xf32> to vector<8x32xf32>
    %406 = math.tanh %405 : vector<8x32xf32>
    %407 = vector.extract_strided_slice %392 {offsets = [0, 96], sizes = [8, 32], strides = [1, 1]} : vector<8x128xf32> to vector<8x32xf32>
    %408 = arith.negf %407 : vector<8x32xf32>
    %409 = math.exp %408 : vector<8x32xf32>
    %cst_84 = arith.constant 1.000000e+00 : f32
    %410 = vector.broadcast %cst_84 : f32 to vector<8x32xf32>
    %411 = arith.addf %410, %409 : vector<8x32xf32>
    %412 = arith.divf %410, %411 : vector<8x32xf32>
    %413 = arith.mulf %404, %387 : vector<8x32xf32>
    %414 = arith.mulf %398, %406 : vector<8x32xf32>
    %415 = arith.addf %413, %414 : vector<8x32xf32>
    %416 = math.tanh %415 : vector<8x32xf32>
    %417 = arith.mulf %412, %416 : vector<8x32xf32>
    %418 = vector.extract_strided_slice %247 {offsets = [48, 0], sizes = [8, 128], strides = [1, 1]} : vector<64x128xf32> to vector<8x128xf32>
    %cst_85 = arith.constant dense<0.000000e+00> : vector<8x128xf32>
    %419 = tpu.matmul %417, %242, %cst_85 {dimension_numbers = #tpu.dot_dimension_numbers<[1], [0], [0], [1], [0, 0, 1, 1], [], []>} : vector<8x32xf32>, vector<32x128xf32>, vector<8x128xf32> -> vector<8x128xf32>
    %420 = arith.addf %418, %419 : vector<8x128xf32>
    %421 = vector.extract_strided_slice %420 {offsets = [0, 0], sizes = [8, 32], strides = [1, 1]} : vector<8x128xf32> to vector<8x32xf32>
    %422 = arith.negf %421 : vector<8x32xf32>
    %423 = math.exp %422 : vector<8x32xf32>
    %cst_86 = arith.constant 1.000000e+00 : f32
    %424 = vector.broadcast %cst_86 : f32 to vector<8x32xf32>
    %425 = arith.addf %424, %423 : vector<8x32xf32>
    %426 = arith.divf %424, %425 : vector<8x32xf32>
    %427 = vector.extract_strided_slice %420 {offsets = [0, 32], sizes = [8, 32], strides = [1, 1]} : vector<8x128xf32> to vector<8x32xf32>
    %428 = arith.negf %427 : vector<8x32xf32>
    %429 = math.exp %428 : vector<8x32xf32>
    %cst_87 = arith.constant 1.000000e+00 : f32
    %430 = vector.broadcast %cst_87 : f32 to vector<8x32xf32>
    %431 = arith.addf %430, %429 : vector<8x32xf32>
    %432 = arith.divf %430, %431 : vector<8x32xf32>
    %433 = vector.extract_strided_slice %420 {offsets = [0, 64], sizes = [8, 32], strides = [1, 1]} : vector<8x128xf32> to vector<8x32xf32>
    %434 = math.tanh %433 : vector<8x32xf32>
    %435 = vector.extract_strided_slice %420 {offsets = [0, 96], sizes = [8, 32], strides = [1, 1]} : vector<8x128xf32> to vector<8x32xf32>
    %436 = arith.negf %435 : vector<8x32xf32>
    %437 = math.exp %436 : vector<8x32xf32>
    %cst_88 = arith.constant 1.000000e+00 : f32
    %438 = vector.broadcast %cst_88 : f32 to vector<8x32xf32>
    %439 = arith.addf %438, %437 : vector<8x32xf32>
    %440 = arith.divf %438, %439 : vector<8x32xf32>
    %441 = arith.mulf %432, %415 : vector<8x32xf32>
    %442 = arith.mulf %426, %434 : vector<8x32xf32>
    %443 = arith.addf %441, %442 : vector<8x32xf32>
    %444 = math.tanh %443 : vector<8x32xf32>
    %445 = arith.mulf %440, %444 : vector<8x32xf32>
    %446 = vector.extract_strided_slice %247 {offsets = [56, 0], sizes = [8, 128], strides = [1, 1]} : vector<64x128xf32> to vector<8x128xf32>
    %cst_89 = arith.constant dense<0.000000e+00> : vector<8x128xf32>
    %447 = tpu.matmul %445, %242, %cst_89 {dimension_numbers = #tpu.dot_dimension_numbers<[1], [0], [0], [1], [0, 0, 1, 1], [], []>} : vector<8x32xf32>, vector<32x128xf32>, vector<8x128xf32> -> vector<8x128xf32>
    %448 = arith.addf %446, %447 : vector<8x128xf32>
    %449 = vector.extract_strided_slice %448 {offsets = [0, 0], sizes = [8, 32], strides = [1, 1]} : vector<8x128xf32> to vector<8x32xf32>
    %450 = arith.negf %449 : vector<8x32xf32>
    %451 = math.exp %450 : vector<8x32xf32>
    %cst_90 = arith.constant 1.000000e+00 : f32
    %452 = vector.broadcast %cst_90 : f32 to vector<8x32xf32>
    %453 = arith.addf %452, %451 : vector<8x32xf32>
    %454 = arith.divf %452, %453 : vector<8x32xf32>
    %455 = vector.extract_strided_slice %448 {offsets = [0, 32], sizes = [8, 32], strides = [1, 1]} : vector<8x128xf32> to vector<8x32xf32>
    %456 = arith.negf %455 : vector<8x32xf32>
    %457 = math.exp %456 : vector<8x32xf32>
    %cst_91 = arith.constant 1.000000e+00 : f32
    %458 = vector.broadcast %cst_91 : f32 to vector<8x32xf32>
    %459 = arith.addf %458, %457 : vector<8x32xf32>
    %460 = arith.divf %458, %459 : vector<8x32xf32>
    %461 = vector.extract_strided_slice %448 {offsets = [0, 64], sizes = [8, 32], strides = [1, 1]} : vector<8x128xf32> to vector<8x32xf32>
    %462 = math.tanh %461 : vector<8x32xf32>
    %463 = vector.extract_strided_slice %448 {offsets = [0, 96], sizes = [8, 32], strides = [1, 1]} : vector<8x128xf32> to vector<8x32xf32>
    %464 = arith.negf %463 : vector<8x32xf32>
    %465 = math.exp %464 : vector<8x32xf32>
    %cst_92 = arith.constant 1.000000e+00 : f32
    %466 = vector.broadcast %cst_92 : f32 to vector<8x32xf32>
    %467 = arith.addf %466, %465 : vector<8x32xf32>
    %468 = arith.divf %466, %467 : vector<8x32xf32>
    %469 = arith.mulf %460, %443 : vector<8x32xf32>
    %470 = arith.mulf %454, %462 : vector<8x32xf32>
    %471 = arith.addf %469, %470 : vector<8x32xf32>
    %472 = math.tanh %471 : vector<8x32xf32>
    %473 = arith.mulf %468, %472 : vector<8x32xf32>
    %c0_93 = arith.constant 0 : index
    %c0_94 = arith.constant 0 : index
    %474 = vector.load %arg7[%c0_93, %c0_94] : memref<32x8xf32, #tpu.memory_space<vmem>>, vector<32x8xf32>
    %cst_95 = arith.constant dense<0.000000e+00> : vector<8x8xf32>
    %475 = tpu.matmul %473, %474, %cst_95 {dimension_numbers = #tpu.dot_dimension_numbers<[1], [0], [0], [1], [0, 0, 1, 1], [], []>} : vector<8x32xf32>, vector<32x8xf32>, vector<8x8xf32> -> vector<8x8xf32>
    %c0_96 = arith.constant 0 : index
    %c0_97 = arith.constant 0 : index
    %476 = vector.load %arg8[%c0_96, %c0_97] : memref<1x8xf32, #tpu.memory_space<vmem>>, vector<1x8xf32>
    %477 = vector.broadcast %476 : vector<1x8xf32> to vector<8x8xf32>
    %478 = arith.addf %475, %477 : vector<8x8xf32>
    %cst_98 = arith.constant dense<0xFF800000> : vector<8xf32>
    %479 = vector.multi_reduction <maximumf>, %478, %cst_98 [1] : vector<8x8xf32> to vector<8xf32>
    %480 = vector.shape_cast %479 : vector<8xf32> to vector<8x1xf32>
    %481 = vector.broadcast %480 : vector<8x1xf32> to vector<8x8xf32>
    %482 = arith.subf %478, %481 : vector<8x8xf32>
    %483 = math.exp %482 : vector<8x8xf32>
    %cst_99 = arith.constant dense<0.000000e+00> : vector<8xf32>
    %484 = vector.multi_reduction <add>, %483, %cst_99 [1] : vector<8x8xf32> to vector<8xf32>
    %485 = vector.shape_cast %484 : vector<8xf32> to vector<8x1xf32>
    %486 = tpu.reciprocal %485 : vector<8x1xf32> -> vector<8x1xf32>
    %487 = vector.broadcast %486 : vector<8x1xf32> to vector<8x8xf32>
    %488 = arith.mulf %483, %487 : vector<8x8xf32>
    %c0_100 = arith.constant 0 : index
    %c0_101 = arith.constant 0 : index
    %489 = vector.load %arg9[%c0_100, %c0_101] : memref<8x8xf32, #tpu.memory_space<vmem>>, vector<8x8xf32>
    tpu.vector_store %arg9[%c0_100, %c0_101], %488 {strides = array<i32>} : memref<8x8xf32, #tpu.memory_space<vmem>>, vector<8x8xf32>,
    return
  }
}

</mosaic_0001>

<bundles_post_ra>
// kernel: lstm_model_2d_forward.1
= control target key start
LH: loop header
LB: loop body
LE: loop exit
PB: predicated region body
PF: predicated region fallthrough
CT: control target
= control target key end

     0   :  { %vm53_vm0 = vcmask 130048   ;;  %v2682_v0 = vmov 0.0|0.0   ;;  %vm2683_vm1 = vmmov 0   ;;  %v2684_v4 = vmov 0.0   ;;  %s2685_s25 = smov 64   ;;  %s3100_s1 = inlined_call_operand.vmem [shape: f32[16,128], index: 1, kind: input, shape index: {}]   ;;  %s3101_s2 = inlined_call_operand.vmem [shape: f32[32,128], index: 2, kind: input, shape index: {}]   ;;  %s3102_s0 = inlined_call_operand.vmem [shape: f32[64,16], index: 0, kind: input, shape index: {}]   ;;  %s3103_s3 = inlined_call_operand.vmem [shape: f32[1,128], index: 3, kind: input, shape index: {}]   ;;  %s3104_s4 = inlined_call_operand.vmem [shape: f32[32,128], index: 4, kind: input, shape index: {}]   ;;  %s3105_s5 = inlined_call_operand.vmem [shape: f32[32,128], index: 5, kind: input, shape index: {}]   ;;  %s3106_s6 = inlined_call_operand.vmem [shape: f32[1,128], index: 6, kind: input, shape index: {}]   ;;  %s3107_s7 = inlined_call_operand.vmem [shape: f32[32,8], index: 7, kind: input, shape index: {}]   ;;  %s3108_s8 = inlined_call_operand.vmem [shape: f32[1,8], index: 8, kind: input, shape index: {}]   ;;  %s3109_s9 = inlined_call_operand.vmem [shape: f32[8,8], index: 9, kind: output, shape index: {}]  }
   0x1   :  { %2435 = vmatprep.subr.bf16.mxu1 %v2682_v0  ;;  %v32_v1 = vld [vmem:[%s3100_s1] sm:$0xff]  ;;  %v33_v2 = vld [vmem:[%s3100_s1 + $0x8] sm:$0xff]  ;;  %2232 = vmatprep.mubr.msk.f32.mxu1 %vm2683_vm1, %v2684_v4  ;;  %v36_v9 = vld [vmem:[%s3101_s2 + $0x10] sm:$0xff]  ;;  %vm183_vm2 = vcmask 261120   ;;  %vm2034_vm3 = vcmask 64512  }
   0x2   :  { %v34_v3 = vld [vmem:[%s3101_s2] sm:$0xff]  ;;  %v2431_v5 = vpack.c.bf16 %v33_v2, %v32_v1  ;;  %v35_v6 = vld [vmem:[%s3101_s2 + $0x8] sm:$0xff]  ;;  %v37_v10 = vld [vmem:[%s3101_s2 + $0x18] sm:$0xff] }
   0x3   :  { %v39_v7 = vld [vmem:[%s3102_s0] sm:$0xff]  ;;  %v2755_v8 = vpack.c.bf16 %v35_v6, %v34_v3  ;;  %v40_v11 = vld [vmem:[%s3102_s0 + $0x8] sm:$0xff]  ;;  %v2768_v12 = vpack.c.bf16 %v37_v10, %v36_v9  ;;  %v41_v48 = vld [vmem:[%s3102_s0 + $0x10] sm:$0xff] }
   0x4   :  { %2212 = vmatprep.mubr.msk.f32.mxu0 %vm53_vm0, %v39_v7  ;;  %2432 = vmatprep.subr.bf16.mxu0 %v2431_v5  ;;  %v2789_v13 = vld [vmem:[%s3103_s3] ss:$0 sm:$0xff]  ;;  %s2686_s3 = smov 32   ;;  %v42_v49 = vld [vmem:[%s3102_s0 + $0x18] sm:$0xff]  ;;  %v44_v51 = vld [vmem:[%s3102_s0 + $0x28] sm:$0xff] }
   0x5   :  { %2437 = vmatpush3.bf16.msra.mxu1 %v2755_v8  ;;  %2434 = vmatpush3.bf16.msra.mxu0 %v2431_v5  ;;  %v43_v50 = vld [vmem:[%s3102_s0 + $0x20] sm:$0xff]  ;;  %v45_v52 = vld [vmem:[%s3102_s0 + $0x30] sm:$0xff]  ;;  %v46_v53 = vld [vmem:[%s3102_s0 + $0x38] sm:$0xff] }
   0x6   :  { %2438 = vmatprep.subr.bf16.mxu1 %v2682_v0  ;;  %2447 = vmatprep.subr.bf16.mxu0 %v2682_v0 }
   0x8   :  { %2213 = vmatmul.mubr.msk.f32.vlgmr.msra.gmra.mrb[0].mxu0 %vm53_vm0, %v40_v11 }
   0x9   :  { %2440 = vmatpush3.bf16.msra.mxu1 %v2768_v12  ;;  %2449 = vmatpush3.bf16.msra.mxu0 %v2755_v8 }
   0xa   :  { %2441 = vmatprep.subr.bf16.mxu1 %v2682_v0  ;;  %2450 = vmatprep.subr.bf16.mxu0 %v2682_v0 }
   0xb   :  { %2215 = vmatprep.mubr.msk.f32.mxu0 %vm53_vm0, %v41_v48 }
   0xc   :  { %2233 = vmatmul.mubr.f32.vlgmr.msra.gmra.mrb[0].mxu1 %v2684_v4  ;;  %2216 = vmatmul.mubr.msk.f32.gmra.mrb[2].mxu0 %vm53_vm0, %v42_v49 }
   0xd   :  { %2443 = vmatpush3.bf16.msra.mxu1 %v2755_v8  ;;  %2243 = vmatprep.mubr.msk.f32.mxu1 %vm2683_vm1, %v2684_v4 }
   0xe   :  { %2444 = vmatprep.subr.bf16.mxu1 %v2682_v0  ;;  %2452 = vmatpush3.bf16.msra.mxu0 %v2768_v12 }
   0xf   :  { %2459 = vmatprep.subr.bf16.mxu0 %v2682_v0  ;;  %2218 = vmatprep.mubr.msk.f32.mxu0 %vm53_vm0, %v43_v50 }
  0x10   :  { %2219 = vmatmul.mubr.msk.f32.gmra.mrb[4].mxu0 %vm53_vm0, %v44_v51 }
  0x11   :  { %2446 = vmatpush3.bf16.msra.mxu1 %v2768_v12  ;;  %2221 = vmatprep.mubr.msk.f32.mxu0 %vm53_vm0, %v45_v52 }
  0x12   :  { %2453 = vmatprep.subr.bf16.mxu1 %v2682_v0 }
  0x14   :  { %2222 = vmatmul.mubr.msk.f32.gmra.mrb[6].mxu0 %vm53_vm0, %v46_v53 }
  0x15   :  { %2254 = vmatprep.mubr.msk.f32.mxu0 %vm2683_vm1, %v2684_v4 }
  0xdb   :  { %v2214_v14 = vpop.f32.mrb[0].mxu0 }
  0xdc   :  { %v144_v15 = vpop.f32.mrb[1].mxu0  ;;  %v150_v34 = vadd.f32 %v2214_v14, %v2789_v13 }
  0xdd   :  { %v145_v16 = vadd.f32 %v2789_v13, %v144_v15 }
  0xdf   :  { %v253_v17 = vpop.f32.mrb[0].mxu1  ;;  %v2217_v57 = vpop.f32.mrb[2].mxu0 }
  0xe0   :  { %v257_v18 = vadd.f32 %v253_v17, %v145_v16  ;;  %v2234_v19 = vpop.f32.mrb[1].mxu1  ;;  %v154_v58 = vpop.f32.mrb[3].mxu0 }
  0xe1   :  { %v155_v1 = vadd.f32 %v2789_v13, %v154_v58 }
  0xe2   :  { %2550 = vtanh.f32 %v257_v18  ;;  %v2060_v21 = vmul.f32 -1.442695, %v257_v18 }
  0xe3   :  { %v2835_v59 = vpop.f32.mrb[4].mxu0 }
  0xe4   :  { %2552 = vpow2.f32 %v2060_v21  ;;  %v2837_v60 = vpop.f32.mrb[5].mxu0 }
  0xe7   :  { %v2839_v61 = vpop.f32.mrb[6].mxu0 }
  0xe8   :  { %v2841_v62 = vpop.f32.mrb[7].mxu0 }
  0xec   :  { %v2551_v20 = vpop.eup %2550 }
  0xed   :  { %267 = vrot.lane.b32.xlu0 %v2551_v20, %s2685_s25 }
  0xee   :  { %v2553_v22 = vpop.eup %2552 }
  0xef   :  { %v261_v23 = vadd.f32 1.0, %v2553_v22 }
  0xf1   :  { %2554 = vrcp.f32 %v261_v23  ;;  %v160_v23 = vadd.f32 %v2217_v57, %v2789_v13 }
  0xfb   :  { %v2555_v24 = vpop.eup %2554 }
  0xfc   :  { %v265_v27 = vmul.f32 0.0, %v2555_v24 }
 0x15f   :  { %v268_v25 = vpop.permute.xlu0 %267 }
 0x160   :  { %v270_v26 = vmul.f32 %v2555_v24, %v268_v25 }
 0x162   :  { %272 = vrot.lane.b32.xlu0 %v270_v26, %s2686_s3 }
 0x1d4   :  { %v273_v28 = vpop.permute.xlu0 %272 }
 0x1d5   :  { %v275_v29 = vadd.f32 %v273_v28, %v265_v27 }
 0x1d7   :  { %2556 = vtanh.f32 %v275_v29 }
 0x1e1   :  { %v2557_v30 = vpop.eup %2556 }
 0x1e2   :  { %278 = vrot.lane.b32.xlu1 %v2557_v30, %s2685_s25 }
 0x254   :  { %v279_v31 = vpop.permute.xlu1 %278 }
 0x255   :  { %v281_v32 = vmul.f32 %v2555_v24, %v279_v31 }
 0x257   :  { %283 = vrot.lane.b32.xlu1 %v281_v32, %s2686_s3 }
 0x2c9   :  { %v284_v33 = vpop.permute.xlu1 %283 }
 0x2ca   :  { %286 = vst.msk [vmem:[#allocation2] sm:$0xff] %vm183_vm2, %v284_v33  ;;  %2244 = vmatmul.mubr.msk.f32.vlgmr.msra.gmra.mrb[2].mxu1 %vm183_vm2, %v284_v33 }
 0x2cb   :  { %2455 = vmatpush3.bf16.msra.mxu1 %v2755_v8  ;;  %2265 = vmatprep.mubr.msk.f32.mxu1 %vm2683_vm1, %v2684_v4 }
 0x2cc   :  { %2456 = vmatprep.subr.bf16.mxu1 %v2682_v0 }
 0x2cf   :  { %2458 = vmatpush3.bf16.msra.mxu1 %v2768_v12 }
 0x2d0   :  { %2465 = vmatprep.subr.bf16.mxu1 %v2682_v0 }
 0x39d   :  { %v355_v35 = vpop.f32.mrb[2].mxu1 }
 0x39e   :  { %v359_v36 = vadd.f32 %v355_v35, %v150_v34  ;;  %v2245_v37 = vpop.f32.mrb[3].mxu1 }
 0x3a0   :  { %2558 = vtanh.f32 %v359_v36  ;;  %v2062_v39 = vmul.f32 -1.442695, %v359_v36 }
 0x3a2   :  { %2560 = vpow2.f32 %v2062_v39 }
 0x3aa   :  { %v2559_v38 = vpop.eup %2558 }
 0x3ab   :  { %369 = vrot.lane.b32.xlu0 %v2559_v38, %s2685_s25 }
 0x3ac   :  { %v2561_v40 = vpop.eup %2560 }
 0x3ad   :  { %v363_v41 = vadd.f32 1.0, %v2561_v40 }
 0x3af   :  { %2562 = vrcp.f32 %v363_v41  ;;  %v165_v41 = vadd.f32 %v2789_v13, %v2837_v60  ;;  %v170_v60 = vadd.f32 %v2835_v59, %v2789_v13 }
 0x3b9   :  { %v2563_v42 = vpop.eup %2562 }
 0x3ba   :  { %v367_v45 = vmul.f32 %v2563_v42, %v275_v29 }
 0x41d   :  { %v370_v43 = vpop.permute.xlu0 %369 }
 0x41e   :  { %v372_v44 = vmul.f32 %v2563_v42, %v370_v43 }
 0x420   :  { %374 = vrot.lane.b32.xlu1 %v372_v44, %s2686_s3 }
 0x492   :  { %v375_v46 = vpop.permute.xlu1 %374 }
 0x493   :  { %v377_v47 = vadd.f32 %v375_v46, %v367_v45 }
 0x495   :  { %2564 = vtanh.f32 %v377_v47 }
 0x49f   :  { %v2565_v54 = vpop.eup %2564 }
 0x4a0   :  { %380 = vrot.lane.b32.xlu0 %v2565_v54, %s2685_s25 }
 0x512   :  { %v381_v55 = vpop.permute.xlu0 %380 }
 0x513   :  { %v383_v56 = vmul.f32 %v2563_v42, %v381_v55 }
 0x515   :  { %385 = vrot.lane.b32.xlu1 %v383_v56, %s2686_s3 }
 0x587   :  { %v386_v63 = vpop.permute.xlu1 %385 }
 0x588   :  { %388 = vst.msk [vmem:[#allocation2 + $0x8] sm:$0xff] %vm183_vm2, %v386_v63  ;;  %2255 = vmatmul.mubr.msk.f32.vlgmr.msra.gmra.mrb[8].mxu0 %vm183_vm2, %v386_v63 }
 0x589   :  { %2461 = vmatpush3.bf16.msra.mxu0 %v2755_v8  ;;  %2276 = vmatprep.mubr.msk.f32.mxu0 %vm2683_vm1, %v2684_v4 }
 0x58a   :  { %2462 = vmatprep.subr.bf16.mxu0 %v2682_v0 }
 0x58d   :  { %2464 = vmatpush3.bf16.msra.mxu0 %v2768_v12 }
 0x58e   :  { %2471 = vmatprep.subr.bf16.mxu0 %v2682_v0 }
 0x65b   :  { %v457_v2 = vpop.f32.mrb[8].mxu0 }
 0x65c   :  { %v461_v3 = vadd.f32 %v457_v2, %v155_v1  ;;  %v2256_v5 = vpop.f32.mrb[9].mxu0 }
 0x65e   :  { %2566 = vtanh.f32 %v461_v3  ;;  %v2064_v7 = vmul.f32 -1.442695, %v461_v3 }
 0x660   :  { %2568 = vpow2.f32 %v2064_v7 }
 0x668   :  { %v2567_v6 = vpop.eup %2566 }
 0x669   :  { %471 = vrot.lane.b32.xlu0 %v2567_v6, %s2685_s25 }
 0x66a   :  { %v2569_v9 = vpop.eup %2568 }
 0x66b   :  { %v465_v10 = vadd.f32 1.0, %v2569_v9 }
 0x66d   :  { %2570 = vrcp.f32 %v465_v10 }
 0x677   :  { %v2571_v11 = vpop.eup %2570 }
 0x678   :  { %v469_v16 = vmul.f32 %v2571_v11, %v377_v47 }
 0x6db   :  { %v472_v14 = vpop.permute.xlu0 %471 }
 0x6dc   :  { %v474_v15 = vmul.f32 %v2571_v11, %v472_v14  ;;  %v1001_v14 = vld [vmem:[%s3104_s4] sm:$0xff] }
 0x6de   :  { %476 = vrot.lane.b32.xlu1 %v474_v15, %s2686_s3  ;;  %v1002_v15 = vld [vmem:[%s3104_s4 + $0x8] sm:$0xff] }
 0x750   :  { %v477_v17 = vpop.permute.xlu1 %476 }
 0x751   :  { %v479_v18 = vadd.f32 %v477_v17, %v469_v16  ;;  %v2483_v16 = vpack.c.bf16 %v1002_v15, %v1001_v14 }
 0x753   :  { %2572 = vtanh.f32 %v479_v18 }
 0x75d   :  { %v2573_v19 = vpop.eup %2572 }
 0x75e   :  { %482 = vrot.lane.b32.xlu0 %v2573_v19, %s2685_s25 }
 0x7d0   :  { %v483_v20 = vpop.permute.xlu0 %482 }
 0x7d1   :  { %v485_v21 = vmul.f32 %v2571_v11, %v483_v20  ;;  %v1003_v20 = vld [vmem:[%s3104_s4 + $0x10] sm:$0xff] }
 0x7d3   :  { %487 = vrot.lane.b32.xlu1 %v485_v21, %s2686_s3  ;;  %v1004_v21 = vld [vmem:[%s3104_s4 + $0x18] sm:$0xff] }
 0x845   :  { %v488_v22 = vpop.permute.xlu1 %487 }
 0x846   :  { %490 = vst.msk [vmem:[#allocation2 + $0x10] sm:$0xff] %vm183_vm2, %v488_v22  ;;  %2266 = vmatmul.mubr.msk.f32.vlgmr.msra.gmra.mrb[4].mxu1 %vm183_vm2, %v488_v22  ;;  %v2487_v22 = vpack.c.bf16 %v1004_v21, %v1003_v20 }
 0x847   :  { %2467 = vmatpush3.bf16.msra.mxu1 %v2755_v8  ;;  %2287 = vmatprep.mubr.msk.f32.mxu1 %vm2683_vm1, %v2684_v4 }
 0x848   :  { %2468 = vmatprep.subr.bf16.mxu1 %v2682_v0 }
 0x84b   :  { %2470 = vmatpush3.bf16.msra.mxu1 %v2768_v12 }
 0x84c   :  { %2477 = vmatprep.subr.bf16.mxu1 %v2682_v0 }
 0x919   :  { %v559_v24 = vpop.f32.mrb[4].mxu1 }
 0x91a   :  { %v563_v25 = vadd.f32 %v559_v24, %v160_v23  ;;  %v2267_v26 = vpop.f32.mrb[5].mxu1  ;;  %v1010_v24 = vld [vmem:[#allocation2] sm:$0xff] }
 0x91b   :  { %v1012_v26 = vld [vmem:[#allocation2 + $0x10] sm:$0xff] }
 0x91c   :  { %2574 = vtanh.f32 %v563_v25  ;;  %v2066_v28 = vmul.f32 -1.442695, %v563_v25  ;;  %v1011_v25 = vld [vmem:[#allocation2 + $0x8] sm:$0xff] }
 0x91e   :  { %2576 = vpow2.f32 %v2066_v28 }
 0x926   :  { %v2575_v27 = vpop.eup %2574 }
 0x927   :  { %573 = vrot.lane.b32.xlu0 %v2575_v27, %s2685_s25 }
 0x928   :  { %v2577_v29 = vpop.eup %2576 }
 0x929   :  { %v567_v30 = vadd.f32 1.0, %v2577_v29 }
 0x92b   :  { %2578 = vrcp.f32 %v567_v30  ;;  %v175_v30 = vadd.f32 %v2789_v13, %v2841_v62 }
 0x935   :  { %v2579_v31 = vpop.eup %2578 }
 0x936   :  { %v571_v34 = vmul.f32 %v2579_v31, %v479_v18 }
 0x999   :  { %v574_v32 = vpop.permute.xlu0 %573 }
 0x99a   :  { %v576_v33 = vmul.f32 %v2579_v31, %v574_v32 }
 0x99c   :  { %578 = vrot.lane.b32.xlu1 %v576_v33, %s2686_s3 }
 0xa0e   :  { %v579_v35 = vpop.permute.xlu1 %578 }
 0xa0f   :  { %v581_v36 = vadd.f32 %v579_v35, %v571_v34 }
 0xa11   :  { %2580 = vtanh.f32 %v581_v36 }
 0xa1b   :  { %v2581_v37 = vpop.eup %2580 }
 0xa1c   :  { %584 = vrot.lane.b32.xlu0 %v2581_v37, %s2685_s25 }
 0xa8e   :  { %v585_v38 = vpop.permute.xlu0 %584 }
 0xa8f   :  { %v587_v39 = vmul.f32 %v2579_v31, %v585_v38 }
 0xa91   :  { %589 = vrot.lane.b32.xlu1 %v587_v39, %s2686_s3 }
 0xb03   :  { %v590_v40 = vpop.permute.xlu1 %589 }
 0xb04   :  { %592 = vst.msk [vmem:[#allocation2 + $0x18] sm:$0xff] %vm183_vm2, %v590_v40  ;;  %2277 = vmatmul.mubr.msk.f32.vlgmr.msra.gmra.mrb[10].mxu0 %vm183_vm2, %v590_v40 }
 0xb05   :  { %2473 = vmatpush3.bf16.msra.mxu0 %v2755_v8  ;;  %2298 = vmatprep.mubr.msk.f32.mxu0 %vm2683_vm1, %v2684_v4 }
 0xb06   :  { %2474 = vmatprep.subr.bf16.mxu0 %v2682_v0 }
 0xb09   :  { %2476 = vmatpush3.bf16.msra.mxu0 %v2768_v12 }
 0xb0a   :  { %2484 = vmatprep.subr.bf16.mxu0 %v2483_v16 }
 0xb0b   :  { %v1013_v27 = vld [vmem:[#allocation2 + $0x18] sm:$0xff] }
 0xbd7   :  { %v661_v42 = vpop.f32.mrb[10].mxu0 }
 0xbd8   :  { %v665_v43 = vadd.f32 %v661_v42, %v165_v41  ;;  %v2278_v44 = vpop.f32.mrb[11].mxu0 }
 0xbda   :  { %2582 = vtanh.f32 %v665_v43  ;;  %v2068_v46 = vmul.f32 -1.442695, %v665_v43 }
 0xbdc   :  { %2584 = vpow2.f32 %v2068_v46 }
 0xbe4   :  { %v2583_v45 = vpop.eup %2582 }
 0xbe5   :  { %675 = vrot.lane.b32.xlu0 %v2583_v45, %s2685_s25 }
 0xbe6   :  { %v2585_v47 = vpop.eup %2584 }
 0xbe7   :  { %v669_v48 = vadd.f32 1.0, %v2585_v47 }
 0xbe9   :  { %2586 = vrcp.f32 %v669_v48 }
 0xbf3   :  { %v2587_v49 = vpop.eup %2586 }
 0xbf4   :  { %v673_v52 = vmul.f32 %v2587_v49, %v581_v36 }
 0xc57   :  { %v676_v50 = vpop.permute.xlu0 %675 }
 0xc58   :  { %v678_v51 = vmul.f32 %v2587_v49, %v676_v50  ;;  %v1005_v50 = vld [vmem:[%s3105_s5] sm:$0xff] }
 0xc5a   :  { %680 = vrot.lane.b32.xlu1 %v678_v51, %s2686_s3  ;;  %v1006_v51 = vld [vmem:[%s3105_s5 + $0x8] sm:$0xff] }
 0xccc   :  { %v681_v53 = vpop.permute.xlu1 %680 }
 0xccd   :  { %v683_v54 = vadd.f32 %v681_v53, %v673_v52  ;;  %v2941_v52 = vpack.c.bf16 %v1006_v51, %v1005_v50  ;;  %v1007_v53 = vld [vmem:[%s3105_s5 + $0x10] sm:$0xff] }
 0xccf   :  { %2588 = vtanh.f32 %v683_v54 }
 0xcd9   :  { %v2589_v55 = vpop.eup %2588 }
 0xcda   :  { %686 = vrot.lane.b32.xlu0 %v2589_v55, %s2685_s25 }
 0xd4c   :  { %v687_v56 = vpop.permute.xlu0 %686 }
 0xd4d   :  { %v689_v57 = vmul.f32 %v2587_v49, %v687_v56 }
 0xd4f   :  { %691 = vrot.lane.b32.xlu1 %v689_v57, %s2686_s3 }
 0xdc1   :  { %v692_v58 = vpop.permute.xlu1 %691 }
 0xdc2   :  { %694 = vst.msk [vmem:[#allocation2 + $0x20] sm:$0xff] %vm183_vm2, %v692_v58  ;;  %2288 = vmatmul.mubr.msk.f32.vlgmr.msra.gmra.mrb[6].mxu1 %vm183_vm2, %v692_v58 }
 0xdc3   :  { %2479 = vmatpush3.bf16.msra.mxu1 %v2755_v8  ;;  %2309 = vmatprep.mubr.msk.f32.mxu1 %vm2683_vm1, %v2684_v4 }
 0xdc4   :  { %2480 = vmatprep.subr.bf16.mxu1 %v2682_v0 }
 0xdc7   :  { %2482 = vmatpush3.bf16.msra.mxu1 %v2768_v12 }
 0xdc8   :  { %2491 = vmatprep.subr.bf16.mxu1 %v2682_v0 }
 0xdc9   :  { %v1014_v28 = vld [vmem:[#allocation2 + $0x20] sm:$0xff] }
 0xe95   :  { %v763_v63 = vpop.f32.mrb[6].mxu1 }
 0xe96   :  { %v767_v1 = vadd.f32 %v763_v63, %v170_v60  ;;  %v2289_v2 = vpop.f32.mrb[7].mxu1  ;;  %v180_v63 = vadd.f32 %v2839_v61, %v2789_v13 }
 0xe98   :  { %2590 = vtanh.f32 %v767_v1  ;;  %v2070_v8 = vmul.f32 -1.442695, %v767_v1 }
 0xe9a   :  { %2592 = vpow2.f32 %v2070_v8  ;;  %v2977_v8 = vld [vmem:[%s3106_s6] ss:$0 sm:$0xff] }
 0xea2   :  { %v2591_v3 = vpop.eup %2590 }
 0xea3   :  { %777 = vrot.lane.b32.xlu0 %v2591_v3, %s2685_s25 }
 0xea4   :  { %v2593_v5 = vpop.eup %2592 }
 0xea5   :  { %v771_v6 = vadd.f32 1.0, %v2593_v5 }
 0xea7   :  { %2594 = vrcp.f32 %v771_v6 }
 0xeb1   :  { %v2595_v7 = vpop.eup %2594 }
 0xeb2   :  { %v775_v10 = vmul.f32 %v2595_v7, %v683_v54  ;;  %v1008_v54 = vld [vmem:[%s3105_s5 + $0x18] sm:$0xff] }
 0xeb3   :  { %v2951_v55 = vpack.c.bf16 %v1008_v54, %v1007_v53 }
 0xf15   :  { %v778_v9 = vpop.permute.xlu0 %777 }
 0xf16   :  { %v780_v12 = vmul.f32 %v2595_v7, %v778_v9 }
 0xf18   :  { %782 = vrot.lane.b32.xlu1 %v780_v12, %s2686_s3 }
 0xf8a   :  { %v783_v11 = vpop.permute.xlu1 %782 }
 0xf8b   :  { %v785_v59 = vadd.f32 %v783_v11, %v775_v10 }
 0xf8d   :  { %2596 = vtanh.f32 %v785_v59 }
 0xf97   :  { %v2597_v17 = vpop.eup %2596 }
 0xf98   :  { %788 = vrot.lane.b32.xlu0 %v2597_v17, %s2685_s25 }
0x100a   :  { %v789_v18 = vpop.permute.xlu0 %788 }
0x100b   :  { %v791_v19 = vmul.f32 %v2595_v7, %v789_v18 }
0x100d   :  { %793 = vrot.lane.b32.xlu1 %v791_v19, %s2686_s3 }
0x107f   :  { %v794_v23 = vpop.permute.xlu1 %793 }
0x1080   :  { %796 = vst.msk [vmem:[#allocation2 + $0x28] sm:$0xff] %vm183_vm2, %v794_v23  ;;  %2299 = vmatmul.mubr.msk.f32.vlgmr.msra.gmra.mrb[12].mxu0 %vm183_vm2, %v794_v23 }
0x1081   :  { %2486 = vmatpush3.bf16.msra.mxu0 %v2483_v16  ;;  %2320 = vmatprep.mubr.msk.f32.mxu0 %vm183_vm2, %v1010_v24 }
0x1082   :  { %2488 = vmatprep.subr.bf16.mxu0 %v2487_v22 }
0x1085   :  { %2490 = vmatpush3.bf16.msra.mxu0 %v2487_v22 }
0x1086   :  { %2503 = vmatprep.subr.bf16.mxu0 %v2682_v0 }
0x1087   :  { %v1015_v29 = vld [vmem:[#allocation2 + $0x28] sm:$0xff] }
0x1088   :  { %2321 = vmatmul.mubr.msk.f32.vlgmr.msra.gmra.mrb[14].mxu0 %vm183_vm2, %v1011_v25 }
0x1089   :  { %2323 = vmatprep.mubr.msk.f32.mxu0 %vm183_vm2, %v1012_v26  ;;  %2505 = vmatpush3.bf16.msra.mxu0 %v2941_v52 }
0x108a   :  { %2506 = vmatprep.subr.bf16.mxu0 %v2682_v0 }
0x108c   :  { %2324 = vmatmul.mubr.msk.f32.gmra.mrb[16].mxu0 %vm183_vm2, %v1013_v27 }
0x108d   :  { %2326 = vmatprep.mubr.msk.f32.mxu0 %vm183_vm2, %v1014_v28  ;;  %2508 = vmatpush3.bf16.msra.mxu0 %v2951_v55 }
0x108e   :  { %2515 = vmatprep.subr.bf16.mxu0 %v2682_v0 }
0x1090   :  { %2327 = vmatmul.mubr.msk.f32.gmra.mrb[18].mxu0 %vm183_vm2, %v1015_v29 }
0x1153   :  { %v865_v31 = vpop.f32.mrb[12].mxu0 }
0x1154   :  { %v869_v32 = vadd.f32 %v865_v31, %v175_v30  ;;  %v2300_v33 = vpop.f32.mrb[13].mxu0 }
0x1156   :  { %2598 = vtanh.f32 %v869_v32  ;;  %v2072_v41 = vmul.f32 -1.442695, %v869_v32 }
0x1158   :  { %2600 = vpow2.f32 %v2072_v41 }
0x115b   :  { %v2919_v34 = vpop.f32.mrb[14].mxu0 }
0x115c   :  { %v1114_v35 = vpop.f32.mrb[15].mxu0 }
0x115d   :  { %v1115_v5 = vadd.f32 %v2977_v8, %v1114_v35 }
0x115f   :  { %v2921_v36 = vpop.f32.mrb[16].mxu0 }
0x1160   :  { %v2599_v37 = vpop.eup %2598  ;;  %v2923_v38 = vpop.f32.mrb[17].mxu0 }
0x1161   :  { %879 = vrot.lane.b32.xlu0 %v2599_v37, %s2685_s25  ;;  %v1120_v37 = vadd.f32 %v2919_v34, %v2977_v8 }
0x1162   :  { %v2601_v62 = vpop.eup %2600 }
0x1163   :  { %v2926_v39 = vpop.f32.mrb[18].mxu0  ;;  %v873_v42 = vadd.f32 1.0, %v2601_v62 }
0x1164   :  { %v2928_v40 = vpop.f32.mrb[19].mxu0 }
0x1165   :  { %2602 = vrcp.f32 %v873_v42 }
0x116f   :  { %v2603_v43 = vpop.eup %2602 }
0x1170   :  { %v877_v46 = vmul.f32 %v2603_v43, %v785_v59 }
0x11d3   :  { %v880_v44 = vpop.permute.xlu0 %879 }
0x11d4   :  { %v882_v45 = vmul.f32 %v2603_v43, %v880_v44 }
0x11d6   :  { %884 = vrot.lane.b32.xlu1 %v882_v45, %s2686_s3 }
0x1248   :  { %v885_v47 = vpop.permute.xlu1 %884 }
0x1249   :  { %v2931_v48 = vadd.f32 %v885_v47, %v877_v46 }
0x124b   :  { %2604 = vtanh.f32 %v2931_v48 }
0x1255   :  { %v2605_v49 = vpop.eup %2604 }
0x1256   :  { %890 = vrot.lane.b32.xlu0 %v2605_v49, %s2685_s25 }
0x12c8   :  { %v891_v56 = vpop.permute.xlu0 %890 }
0x12c9   :  { %v893_v57 = vmul.f32 %v2603_v43, %v891_v56 }
0x12cb   :  { %895 = vrot.lane.b32.xlu1 %v893_v57, %s2686_s3 }
0x133d   :  { %v896_v58 = vpop.permute.xlu1 %895 }
0x133e   :  { %898 = vst.msk [vmem:[#allocation2 + $0x30] sm:$0xff] %vm183_vm2, %v896_v58  ;;  %2310 = vmatmul.mubr.msk.f32.vlgmr.msra.gmra.mrb[8].mxu1 %vm183_vm2, %v896_v58 }
0x133f   :  { %2493 = vmatpush3.bf16.msra.mxu1 %v2941_v52  ;;  %2340 = vmatprep.mubr.msk.f32.mxu1 %vm2683_vm1, %v2684_v4 }
0x1340   :  { %2494 = vmatprep.subr.bf16.mxu1 %v2682_v0 }
0x1343   :  { %2496 = vmatpush3.bf16.msra.mxu1 %v2951_v55 }
0x1344   :  { %2497 = vmatprep.subr.bf16.mxu1 %v2682_v0 }
0x1345   :  { %v1016_v60 = vld [vmem:[#allocation2 + $0x30] sm:$0xff] }
0x1346   :  { %2341 = vmatmul.mubr.f32.vlgmr.msra.gmra.mrb[10].mxu1 %v2684_v4  ;;  %2329 = vmatprep.mubr.msk.f32.mxu0 %vm183_vm2, %v1016_v60 }
0x1347   :  { %2499 = vmatpush3.bf16.msra.mxu1 %v2941_v52  ;;  %2351 = vmatprep.mubr.msk.f32.mxu1 %vm2683_vm1, %v2684_v4 }
0x1348   :  { %2500 = vmatprep.subr.bf16.mxu1 %v2682_v0 }
0x134b   :  { %2502 = vmatpush3.bf16.msra.mxu1 %v2951_v55 }
0x134c   :  { %2509 = vmatprep.subr.bf16.mxu1 %v2682_v0 }
0x1411   :  { %v967_v1 = vpop.f32.mrb[8].mxu1 }
0x1412   :  { %v971_v2 = vadd.f32 %v967_v1, %v180_v63  ;;  %v2311_v3 = vpop.f32.mrb[9].mxu1 }
0x1414   :  { %v2074_v20 = vmul.f32 -1.442695, %v971_v2 }
0x1419   :  { %v1219_v6 = vpop.f32.mrb[10].mxu1 }
0x141a   :  { %v1223_v7 = vadd.f32 %v1219_v6, %v1115_v5  ;;  %v2342_v9 = vpop.f32.mrb[11].mxu1 }
0x141c   :  { %2606 = vtanh.f32 %v1223_v7  ;;  %v2084_v10 = vmul.f32 -1.442695, %v1223_v7 }
0x141e   :  { %2608 = vpow2.f32 %v2084_v10 }
0x1426   :  { %v2607_v12 = vpop.eup %2606 }
0x1427   :  { %1233 = vrot.lane.b32.xlu0 %v2607_v12, %s2685_s25 }
0x1428   :  { %v2609_v13 = vpop.eup %2608 }
0x1429   :  { %v1227_v61 = vadd.f32 1.0, %v2609_v13 }
0x142b   :  { %2610 = vrcp.f32 %v1227_v61 }
0x1435   :  { %v2611_v11 = vpop.eup %2610 }
0x1436   :  { %v1231_v15 = vmul.f32 0.0, %v2611_v11 }
0x1499   :  { %v1234_v59 = vpop.permute.xlu0 %1233 }
0x149a   :  { %v1236_v14 = vmul.f32 %v2611_v11, %v1234_v59 }
0x149c   :  { %1238 = vrot.lane.b32.xlu1 %v1236_v14, %s2686_s3 }
0x150e   :  { %v1239_v16 = vpop.permute.xlu1 %1238 }
0x150f   :  { %v1241_v17 = vadd.f32 %v1239_v16, %v1231_v15 }
0x1511   :  { %2612 = vtanh.f32 %v1241_v17 }
0x1512   :  { %2614 = vtanh.f32 %v971_v2  ;;  %v1125_v2 = vadd.f32 %v2977_v8, %v2923_v38 }
0x1513   :  { %2616 = vpow2.f32 %v2074_v20 }
0x151b   :  { %v2613_v18 = vpop.eup %2612 }
0x151c   :  { %1244 = vrot.lane.b32.xlu0 %v2613_v18, %s2685_s25  ;;  %v2615_v19 = vpop.eup %2614 }
0x151d   :  { %v2617_v21 = vpop.eup %2616 }
0x151e   :  { %v975_v22 = vadd.f32 1.0, %v2617_v21 }
0x1520   :  { %981 = vrot.lane.b32.xlu0 %v2615_v19, %s2685_s25  ;;  %2618 = vrcp.f32 %v975_v22  ;;  %v1130_v19 = vadd.f32 %v2921_v36, %v2977_v8 }
0x152a   :  { %v2619_v25 = vpop.eup %2618 }
0x152b   :  { %v979_v29 = vmul.f32 %v2619_v25, %v2931_v48 }
0x158e   :  { %v1245_v23 = vpop.permute.xlu0 %1244 }
0x158f   :  { %v1247_v24 = vmul.f32 %v2611_v11, %v1245_v23 }
0x1591   :  { %1249 = vrot.lane.b32.xlu1 %v1247_v24, %s2686_s3 }
0x1592   :  { %v982_v26 = vpop.permute.xlu0 %981 }
0x1593   :  { %v984_v27 = vmul.f32 %v2619_v25, %v982_v26 }
0x1595   :  { %986 = vrot.lane.b32.xlu0 %v984_v27, %s2686_s3 }
0x1603   :  { %v1250_v28 = vpop.permute.xlu1 %1249 }
0x1604   :  { %2352 = vmatmul.mubr.msk.f32.vlgmr.msra.gmra.mrb[12].mxu1 %vm183_vm2, %v1250_v28 }
0x1605   :  { %2511 = vmatpush3.bf16.msra.mxu1 %v2941_v52  ;;  %2373 = vmatprep.mubr.msk.f32.mxu1 %vm2683_vm1, %v2684_v4 }
0x1606   :  { %2512 = vmatprep.subr.bf16.mxu1 %v2682_v0 }
0x1607   :  { %v987_v30 = vpop.permute.xlu0 %986 }
0x1608   :  { %v989_v31 = vadd.f32 %v987_v30, %v979_v29 }
0x1609   :  { %2514 = vmatpush3.bf16.msra.mxu1 %v2951_v55 }
0x160a   :  { %2620 = vtanh.f32 %v989_v31  ;;  %2521 = vmatprep.subr.bf16.mxu1 %v2682_v0 }
0x1614   :  { %v2621_v32 = vpop.eup %2620 }
0x1615   :  { %992 = vrot.lane.b32.xlu0 %v2621_v32, %s2685_s25 }
0x1687   :  { %v993_v33 = vpop.permute.xlu0 %992 }
0x1688   :  { %v995_v35 = vmul.f32 %v2619_v25, %v993_v33 }
0x168a   :  { %997 = vrot.lane.b32.xlu0 %v995_v35, %s2686_s3 }
0x16d7   :  { %v1319_v41 = vpop.f32.mrb[12].mxu1 }
0x16d8   :  { %v1323_v62 = vadd.f32 %v1319_v41, %v1120_v37  ;;  %v2353_v42 = vpop.f32.mrb[13].mxu1  ;;  %v1135_v41 = vadd.f32 %v2977_v8, %v2928_v40 }
0x16da   :  { %2622 = vtanh.f32 %v1323_v62  ;;  %v2086_v46 = vmul.f32 -1.442695, %v1323_v62 }
0x16dc   :  { %2624 = vpow2.f32 %v2086_v46 }
0x16e4   :  { %v2623_v43 = vpop.eup %2622 }
0x16e5   :  { %1333 = vrot.lane.b32.xlu1 %v2623_v43, %s2685_s25 }
0x16e6   :  { %v2625_v47 = vpop.eup %2624 }
0x16e7   :  { %v1327_v34 = vadd.f32 1.0, %v2625_v47 }
0x16e9   :  { %2626 = vrcp.f32 %v1327_v34 }
0x16f3   :  { %v2627_v48 = vpop.eup %2626 }
0x16f4   :  { %v1331_v51 = vmul.f32 %v2627_v48, %v1241_v17 }
0x16fc   :  { %v998_v44 = vpop.permute.xlu0 %997 }
0x16fd   :  { %1000 = vst.msk [vmem:[#allocation2 + $0x38] sm:$0xff] %vm183_vm2, %v998_v44 }
0x1704   :  { %v1017_v45 = vld [vmem:[#allocation2 + $0x38] sm:$0xff] }
0x1705   :  { %2330 = vmatmul.mubr.msk.f32.gmra.mrb[20].mxu0 %vm183_vm2, %v1017_v45 }
0x1706   :  { %2362 = vmatprep.mubr.msk.f32.mxu0 %vm2683_vm1, %v2684_v4 }
0x1757   :  { %v1334_v49 = vpop.permute.xlu1 %1333 }
0x1758   :  { %v1336_v50 = vmul.f32 %v2627_v48, %v1334_v49 }
0x175a   :  { %1338 = vrot.lane.b32.xlu1 %v1336_v50, %s2686_s3 }
0x17cc   :  { %v1339_v53 = vpop.permute.xlu1 %1338 }
0x17cd   :  { %v1341_v54 = vadd.f32 %v1339_v53, %v1331_v51 }
0x17cf   :  { %2628 = vtanh.f32 %v1341_v54 }
0x17d8   :  { %v3004_v56 = vpop.f32.mrb[20].mxu0 }
0x17d9   :  { %v2629_v57 = vpop.eup %2628  ;;  %v3006_v58 = vpop.f32.mrb[21].mxu0 }
0x17da   :  { %1344 = vrot.lane.b32.xlu1 %v2629_v57, %s2685_s25 }
0x184c   :  { %v1345_v60 = vpop.permute.xlu1 %1344 }
0x184d   :  { %v1347_v63 = vmul.f32 %v2627_v48, %v1345_v60 }
0x184f   :  { %1349 = vrot.lane.b32.xlu1 %v1347_v63, %s2686_s3  ;;  %v1140_v63 = vadd.f32 %v2926_v39, %v2977_v8 }
0x18c1   :  { %v1350_v1 = vpop.permute.xlu1 %1349 }
0x18c2   :  { %2363 = vmatmul.mubr.msk.f32.vlgmr.msra.gmra.mrb[22].mxu0 %vm183_vm2, %v1350_v1 }
0x18c3   :  { %2517 = vmatpush3.bf16.msra.mxu0 %v2941_v52  ;;  %2384 = vmatprep.mubr.msk.f32.mxu0 %vm2683_vm1, %v2684_v4 }
0x18c4   :  { %2518 = vmatprep.subr.bf16.mxu0 %v2682_v0 }
0x18c7   :  { %2520 = vmatpush3.bf16.msra.mxu0 %v2951_v55 }
0x18c8   :  { %2527 = vmatprep.subr.bf16.mxu0 %v2682_v0 }
0x1995   :  { %v1419_v3 = vpop.f32.mrb[22].mxu0 }
0x1996   :  { %v1423_v5 = vadd.f32 %v1419_v3, %v1125_v2  ;;  %v2364_v6 = vpop.f32.mrb[23].mxu0 }
0x1998   :  { %2630 = vtanh.f32 %v1423_v5  ;;  %v2088_v9 = vmul.f32 -1.442695, %v1423_v5 }
0x199a   :  { %2632 = vpow2.f32 %v2088_v9 }
0x19a2   :  { %v2631_v7 = vpop.eup %2630 }
0x19a3   :  { %1433 = vrot.lane.b32.xlu0 %v2631_v7, %s2685_s25 }
0x19a4   :  { %v2633_v12 = vpop.eup %2632 }
0x19a5   :  { %v1427_v10 = vadd.f32 1.0, %v2633_v12 }
0x19a7   :  { %2634 = vrcp.f32 %v1427_v10 }
0x19b1   :  { %v2635_v13 = vpop.eup %2634 }
0x19b2   :  { %v1431_v59 = vmul.f32 %v2635_v13, %v1341_v54 }
0x1a15   :  { %v1434_v61 = vpop.permute.xlu0 %1433 }
0x1a16   :  { %v1436_v11 = vmul.f32 %v2635_v13, %v1434_v61 }
0x1a18   :  { %1438 = vrot.lane.b32.xlu1 %v1436_v11, %s2686_s3 }
0x1a8a   :  { %v1439_v14 = vpop.permute.xlu1 %1438 }
0x1a8b   :  { %v1441_v38 = vadd.f32 %v1439_v14, %v1431_v59 }
0x1a8d   :  { %2636 = vtanh.f32 %v1441_v38 }
0x1a97   :  { %v2637_v15 = vpop.eup %2636 }
0x1a98   :  { %1444 = vrot.lane.b32.xlu0 %v2637_v15, %s2685_s25 }
0x1b0a   :  { %v1445_v16 = vpop.permute.xlu0 %1444 }
0x1b0b   :  { %v1447_v17 = vmul.f32 %v2635_v13, %v1445_v16 }
0x1b0d   :  { %1449 = vrot.lane.b32.xlu1 %v1447_v17, %s2686_s3 }
0x1b7f   :  { %v1450_v18 = vpop.permute.xlu1 %1449 }
0x1b80   :  { %2374 = vmatmul.mubr.msk.f32.vlgmr.msra.gmra.mrb[14].mxu1 %vm183_vm2, %v1450_v18 }
0x1b81   :  { %2523 = vmatpush3.bf16.msra.mxu1 %v2941_v52  ;;  %2395 = vmatprep.mubr.msk.f32.mxu1 %vm2683_vm1, %v2684_v4 }
0x1b82   :  { %2524 = vmatprep.subr.bf16.mxu1 %v2682_v0 }
0x1b85   :  { %2526 = vmatpush3.bf16.msra.mxu1 %v2951_v55 }
0x1b86   :  { %2533 = vmatprep.subr.bf16.mxu1 %v2682_v0 }
0x1c53   :  { %v1519_v20 = vpop.f32.mrb[14].mxu1 }
0x1c54   :  { %v1523_v21 = vadd.f32 %v1519_v20, %v1130_v19  ;;  %v2375_v22 = vpop.f32.mrb[15].mxu1 }
0x1c56   :  { %2638 = vtanh.f32 %v1523_v21  ;;  %v2090_v24 = vmul.f32 -1.442695, %v1523_v21 }
0x1c58   :  { %2640 = vpow2.f32 %v2090_v24 }
0x1c60   :  { %v2639_v23 = vpop.eup %2638 }
0x1c61   :  { %1533 = vrot.lane.b32.xlu0 %v2639_v23, %s2685_s25 }
0x1c62   :  { %v2641_v25 = vpop.eup %2640 }
0x1c63   :  { %v1527_v26 = vadd.f32 1.0, %v2641_v25 }
0x1c65   :  { %2642 = vrcp.f32 %v1527_v26 }
0x1c6f   :  { %v2643_v27 = vpop.eup %2642 }
0x1c70   :  { %v1531_v30 = vmul.f32 %v2643_v27, %v1441_v38  ;;  %v1145_v38 = vadd.f32 %v2977_v8, %v3006_v58 }
0x1cd3   :  { %v1534_v28 = vpop.permute.xlu0 %1533 }
0x1cd4   :  { %v1536_v29 = vmul.f32 %v2643_v27, %v1534_v28 }
0x1cd6   :  { %1538 = vrot.lane.b32.xlu1 %v1536_v29, %s2686_s3 }
0x1d48   :  { %v1539_v31 = vpop.permute.xlu1 %1538 }
0x1d49   :  { %v1541_v36 = vadd.f32 %v1539_v31, %v1531_v30  ;;  %v1150_v30 = vadd.f32 %v3004_v56, %v2977_v8  ;;  %v1948_v56 = vld [vmem:[%s3107_s7] sm:$0xff] }
0x1d4b   :  { %2644 = vtanh.f32 %v1541_v36 }
0x1d55   :  { %v2645_v32 = vpop.eup %2644 }
0x1d56   :  { %1544 = vrot.lane.b32.xlu0 %v2645_v32, %s2685_s25 }
0x1dc8   :  { %v1545_v33 = vpop.permute.xlu0 %1544 }
0x1dc9   :  { %v1547_v35 = vmul.f32 %v2643_v27, %v1545_v33 }
0x1dcb   :  { %1549 = vrot.lane.b32.xlu1 %v1547_v35, %s2686_s3 }
0x1e3d   :  { %v1550_v37 = vpop.permute.xlu1 %1549 }
0x1e3e   :  { %2385 = vmatmul.mubr.msk.f32.vlgmr.msra.gmra.mrb[24].mxu0 %vm183_vm2, %v1550_v37 }
0x1e3f   :  { %2529 = vmatpush3.bf16.msra.mxu0 %v2941_v52  ;;  %2406 = vmatprep.mubr.msk.f32.mxu0 %vm2683_vm1, %v2684_v4 }
0x1e40   :  { %2530 = vmatprep.subr.bf16.mxu0 %v2682_v0 }
0x1e43   :  { %2532 = vmatpush3.bf16.msra.mxu0 %v2951_v55 }
0x1e44   :  { %2539 = vmatprep.subr.bf16.mxu0 %v2682_v0 }
0x1f11   :  { %v1619_v62 = vpop.f32.mrb[24].mxu0 }
0x1f12   :  { %v1623_v42 = vadd.f32 %v1619_v62, %v1135_v41  ;;  %v2386_v43 = vpop.f32.mrb[25].mxu0 }
0x1f14   :  { %2646 = vtanh.f32 %v1623_v42  ;;  %v2092_v45 = vmul.f32 -1.442695, %v1623_v42 }
0x1f16   :  { %2648 = vpow2.f32 %v2092_v45 }
0x1f1e   :  { %v2647_v44 = vpop.eup %2646 }
0x1f1f   :  { %1633 = vrot.lane.b32.xlu0 %v2647_v44, %s2685_s25 }
0x1f20   :  { %v2649_v46 = vpop.eup %2648 }
0x1f21   :  { %v1627_v47 = vadd.f32 1.0, %v2649_v46  ;;  %v1949_v46 = vld [vmem:[%s3107_s7 + $0x8] sm:$0xff] }
0x1f23   :  { %2650 = vrcp.f32 %v1627_v47  ;;  %v1950_v47 = vld [vmem:[%s3107_s7 + $0x10] sm:$0xff] }
0x1f2d   :  { %v2651_v34 = vpop.eup %2650 }
0x1f2e   :  { %v1631_v50 = vmul.f32 %v2651_v34, %v1541_v36 }
0x1f91   :  { %v1634_v48 = vpop.permute.xlu0 %1633 }
0x1f92   :  { %v1636_v49 = vmul.f32 %v2651_v34, %v1634_v48  ;;  %v1951_v48 = vld [vmem:[%s3107_s7 + $0x18] sm:$0xff] }
0x1f94   :  { %1638 = vrot.lane.b32.xlu1 %v1636_v49, %s2686_s3  ;;  %v2543_v49 = vpack.c.bf16 %v1951_v48, %v1950_v47 }
0x2006   :  { %v1639_v51 = vpop.permute.xlu1 %1638 }
0x2007   :  { %v1641_v40 = vadd.f32 %v1639_v51, %v1631_v50 }
0x2009   :  { %2652 = vtanh.f32 %v1641_v40 }
0x2013   :  { %v2653_v53 = vpop.eup %2652 }
0x2014   :  { %1644 = vrot.lane.b32.xlu0 %v2653_v53, %s2685_s25 }
0x2086   :  { %v1645_v54 = vpop.permute.xlu0 %1644 }
0x2087   :  { %v1647_v57 = vmul.f32 %v2651_v34, %v1645_v54  ;;  %v2540_v34 = vpack.c.bf16 %v1949_v46, %v1948_v56  ;;  %v2099_v54 = vld [vmem:[%s3108_s8] ss:$0 sm:$0xff] }
0x2089   :  { %1649 = vrot.lane.b32.xlu1 %v1647_v57, %s2686_s3 }
0x20fb   :  { %v1650_v60 = vpop.permute.xlu1 %1649 }
0x20fc   :  { %2396 = vmatmul.mubr.msk.f32.vlgmr.msra.gmra.mrb[16].mxu1 %vm183_vm2, %v1650_v60 }
0x20fd   :  { %2535 = vmatpush3.bf16.msra.mxu1 %v2941_v52  ;;  %2417 = vmatprep.mubr.msk.f32.mxu1 %vm2683_vm1, %v2684_v4 }
0x20fe   :  { %2536 = vmatprep.subr.bf16.mxu1 %v2682_v0 }
0x2101   :  { %2538 = vmatpush3.bf16.msra.mxu1 %v2951_v55 }
0x21cf   :  { %v1719_v1 = vpop.f32.mrb[16].mxu1 }
0x21d0   :  { %v1723_v2 = vadd.f32 %v1719_v1, %v1140_v63  ;;  %v2397_v3 = vpop.f32.mrb[17].mxu1 }
0x21d2   :  { %2654 = vtanh.f32 %v1723_v2  ;;  %v2094_v6 = vmul.f32 -1.442695, %v1723_v2 }
0x21d4   :  { %2656 = vpow2.f32 %v2094_v6 }
0x21dc   :  { %v2655_v5 = vpop.eup %2654 }
0x21dd   :  { %1733 = vrot.lane.b32.xlu0 %v2655_v5, %s2685_s25 }
0x21de   :  { %v2657_v52 = vpop.eup %2656 }
0x21df   :  { %v1727_v7 = vadd.f32 1.0, %v2657_v52 }
0x21e1   :  { %2658 = vrcp.f32 %v1727_v7 }
0x21eb   :  { %v2659_v9 = vpop.eup %2658 }
0x21ec   :  { %v1731_v55 = vmul.f32 %v2659_v9, %v1641_v40 }
0x224f   :  { %v1734_v12 = vpop.permute.xlu0 %1733 }
0x2250   :  { %v1736_v10 = vmul.f32 %v2659_v9, %v1734_v12 }
0x2252   :  { %1738 = vrot.lane.b32.xlu1 %v1736_v10, %s2686_s3 }
0x22c4   :  { %v1739_v13 = vpop.permute.xlu1 %1738 }
0x22c5   :  { %v1741_v39 = vadd.f32 %v1739_v13, %v1731_v55 }
0x22c7   :  { %2660 = vtanh.f32 %v1741_v39 }
0x22d1   :  { %v2661_v61 = vpop.eup %2660 }
0x22d2   :  { %1744 = vrot.lane.b32.xlu0 %v2661_v61, %s2685_s25 }
0x2344   :  { %v1745_v11 = vpop.permute.xlu0 %1744 }
0x2345   :  { %v1747_v59 = vmul.f32 %v2659_v9, %v1745_v11 }
0x2347   :  { %1749 = vrot.lane.b32.xlu1 %v1747_v59, %s2686_s3 }
0x23b9   :  { %v1750_v14 = vpop.permute.xlu1 %1749 }
0x23ba   :  { %2407 = vmatmul.mubr.msk.f32.vlgmr.msra.gmra.mrb[26].mxu0 %vm183_vm2, %v1750_v14 }
0x23bb   :  { %2428 = vmatprep.mubr.msk.f32.mxu0 %vm2683_vm1, %v2684_v4  ;;  %2541 = vmatpush3.bf16.msra.mxu0 %v2540_v34 }
0x23bc   :  { %2542 = vmatprep.subr.bf16.mxu0 %v2682_v0 }
0x23bf   :  { %2544 = vmatpush3.bf16.msra.mxu0 %v2543_v49 }
0x248d   :  { %v1819_v15 = vpop.f32.mrb[26].mxu0 }
0x248e   :  { %v1823_v16 = vadd.f32 %v1819_v15, %v1145_v38  ;;  %v2408_v17 = vpop.f32.mrb[27].mxu0 }
0x2490   :  { %2662 = vtanh.f32 %v1823_v16  ;;  %v2096_v19 = vmul.f32 -1.442695, %v1823_v16 }
0x2492   :  { %2664 = vpow2.f32 %v2096_v19 }
0x249a   :  { %v2663_v18 = vpop.eup %2662 }
0x249b   :  { %1833 = vrot.lane.b32.xlu0 %v2663_v18, %s2685_s25 }
0x249c   :  { %v2665_v20 = vpop.eup %2664 }
0x249d   :  { %v1827_v21 = vadd.f32 1.0, %v2665_v20 }
0x249f   :  { %2666 = vrcp.f32 %v1827_v21 }
0x24a9   :  { %v2667_v22 = vpop.eup %2666 }
0x24aa   :  { %v1831_v4 = vmul.f32 %v2667_v22, %v1741_v39 }
0x250d   :  { %v1834_v23 = vpop.permute.xlu0 %1833 }
0x250e   :  { %v1836_v24 = vmul.f32 %v2667_v22, %v1834_v23 }
0x2510   :  { %1838 = vrot.lane.b32.xlu1 %v1836_v24, %s2686_s3 }
0x2582   :  { %v1839_v25 = vpop.permute.xlu1 %1838 }
0x2583   :  { %v1841_v58 = vadd.f32 %v1839_v25, %v1831_v4 }
0x2585   :  { %2668 = vtanh.f32 %v1841_v58 }
0x258f   :  { %v2669_v26 = vpop.eup %2668 }
0x2590   :  { %1844 = vrot.lane.b32.xlu0 %v2669_v26, %s2685_s25 }
0x2602   :  { %v1845_v27 = vpop.permute.xlu0 %1844 }
0x2603   :  { %v1847_v28 = vmul.f32 %v2667_v22, %v1845_v27 }
0x2605   :  { %1849 = vrot.lane.b32.xlu1 %v1847_v28, %s2686_s3 }
0x2677   :  { %v1850_v29 = vpop.permute.xlu1 %1849 }
0x2678   :  { %2418 = vmatmul.mubr.msk.f32.vlgmr.msra.gmra.mrb[18].mxu1 %vm183_vm2, %v1850_v29 }
0x274b   :  { %v1919_v31 = vpop.f32.mrb[18].mxu1 }
0x274c   :  { %v1923_v36 = vadd.f32 %v1919_v31, %v1150_v30  ;;  %v2419_v32 = vpop.f32.mrb[19].mxu1 }
0x274e   :  { %2670 = vtanh.f32 %v1923_v36  ;;  %v2098_v35 = vmul.f32 -1.442695, %v1923_v36 }
0x2750   :  { %2672 = vpow2.f32 %v2098_v35 }
0x2758   :  { %v2671_v33 = vpop.eup %2670 }
0x2759   :  { %1933 = vrot.lane.b32.xlu0 %v2671_v33, %s2685_s25 }
0x275a   :  { %v2673_v37 = vpop.eup %2672 }
0x275b   :  { %v1927_v41 = vadd.f32 1.0, %v2673_v37 }
0x275d   :  { %2674 = vrcp.f32 %v1927_v41 }
0x2767   :  { %v2675_v62 = vpop.eup %2674 }
0x2768   :  { %v1931_v44 = vmul.f32 %v2675_v62, %v1841_v58 }
0x27cb   :  { %v1934_v42 = vpop.permute.xlu0 %1933 }
0x27cc   :  { %v1936_v43 = vmul.f32 %v2675_v62, %v1934_v42 }
0x27ce   :  { %1938 = vrot.lane.b32.xlu1 %v1936_v43, %s2686_s3 }
0x2840   :  { %v1939_v45 = vpop.permute.xlu1 %1938 }
0x2841   :  { %v1941_v8 = vadd.f32 %v1939_v45, %v1931_v44 }
0x2843   :  { %2676 = vtanh.f32 %v1941_v8 }
0x284d   :  { %v2677_v50 = vpop.eup %2676 }
0x284e   :  { %1944 = vrot.lane.b32.xlu0 %v2677_v50, %s2685_s25 }
0x28c0   :  { %v1945_v51 = vpop.permute.xlu0 %1944 }
0x28c1   :  { %v1947_v40 = vmul.f32 %v2675_v62, %v1945_v51 }
0x28c3   :  { %1960 = vrot.lane.b32.xlu1 %v1947_v40, %s2686_s3 }
0x2935   :  { %v1961_v53 = vpop.permute.xlu1 %1960 }
0x2936   :  { %2429 = vmatmul.mubr.msk.f32.vlgmr.msra.gmra.mrb[28].mxu0 %vm183_vm2, %v1961_v53 }
0x2a09   :  { %v2030_v57 = vpop.f32.mrb[28].mxu0 }
0x2a0a   :  { %v2031_v60 = vadd.f32 %v2099_v54, %v2030_v57  ;;  %v2430_v63 = vpop.f32.mrb[29].mxu0 }
0x2a0c   :  { %v2035_v0 = vsel %vm2034_vm3, %v2031_v60, -inf }
0x2a0d   :  { %2036 = vmax.xlane.f32.xlu0 %v2035_v0 }
0x2a9a   :  { %v2037_v1 = vpop.xlane.xlu0 %2036 }
0x2a9b   :  { %v2038_v2 = vsub.f32 %v2031_v60, %v2037_v1 }
0x2a9d   :  { %v2039_v3 = vmul.f32 1.442695, %v2038_v2 }
0x2a9f   :  { %2678 = vpow2.f32 %v2039_v3 }
0x2aa9   :  { %v2679_v5 = vpop.eup %2678 }
0x2aaa   :  { %v2041_v6 = vsel %vm2034_vm3, %v2679_v5, 0.0 }
0x2aab   :  { %2042 = vadd.xlane.f32.xlu1 %v2041_v6 }
0x2b38   :  { %v2043_v52 = vpop.xlane.xlu1 %2042 }
0x2b39   :  { %2680 = vrcp.f32 %v2043_v52 }
0x2b43   :  { %v2681_v7 = vpop.eup %2680 }
0x2b44   :  { %v2045_v9 = vmul.f32 %v2681_v7, %v2679_v5 }
0x2b46   :  { %2046 = vst.msk [vmem:[%s3109_s9] sm:$0xff] %vm2034_vm3, %v2045_v9 }

</bundles_post_ra>
